<compile_context>
chip_gen: v5e
topology: v5e:2x2
jax: 0.10.0
libtpu: 0.0.40
codegen_flags: <defaults>
</compile_context>

<pallas_src>
import functools

import jax
import jax.numpy as jnp
from jax.experimental import pallas as pl
from jax.experimental.pallas import tpu as pltpu


def temp_lstm_kernel(x_ref, wih1_ref, wbig_ref, bias_ref, wfc_ref, bfc_ref,
                     out_ref, g_ref, *, hidden_size, seq_len, batch_pad):
    H = hidden_size
    T = seq_len
    Bp = batch_pad
    H2 = 2 * H

    # ---- Prologue: layer-1 input projection for ALL timesteps, one MXU call,
    # ---- written straight into the interleaved gate layout
    # ----   [i1 i2 | f1 f2 | g1 g2 | o1 o2]   (each block H lanes wide)
    # ---- with both layers' biases folded in (layer-2 blocks hold just b2).
    g_ref[...] = (jnp.dot(x_ref[...], wih1_ref[...],
                          preferred_element_type=jnp.float32)
                  + bias_ref[...])

    wbig = wbig_ref[...]    # (2H, 8H) fused, skewed recurrent weights
    bias = bias_ref[...]    # (1, 8H)

    def act(gates):
        # Full-width activations: 2 EUP passes over the whole packed tile
        # instead of 8 narrow per-gate passes on the serial critical path.
        return jax.nn.sigmoid(gates), jnp.tanh(gates)

    # ---- Prime: h1(0), c1(0) from layer-1 gates at t=0 (h(-1)=c(-1)=0). -----
    g0 = g_ref[pl.ds(0, Bp), :]
    sig0, tnh0 = act(g0)
    c1_0 = sig0[:, 0:H] * tnh0[:, 4 * H:5 * H]          # i1 * g1
    h1_0 = sig0[:, 6 * H:7 * H] * jnp.tanh(c1_0)        # o1 * tanh(c1)
    zH = jnp.zeros((Bp, H), jnp.float32)
    hcat0 = jnp.concatenate([h1_0, zH], axis=-1)        # [h1(0), h2(-1)=0]
    cpk0 = jnp.concatenate([c1_0, zH], axis=-1)         # [c1(0), c2(-1)=0]

    # ---- Skewed recurrence: iteration k computes gates1(k) AND gates2(k-1)
    # ---- with a single (Bp,2H) x (2H,8H) MXU push. --------------------------
    def step(k, carry):
        hcat, cpk = carry                               # [h1(k-1), h2(k-2)]
        start = pl.multiple_of(k * Bp, Bp)              # sublane-aligned slice
        gk = g_ref[pl.ds(start, Bp), :]                 # x(k)-proj + biases
        gates = jnp.dot(hcat, wbig,
                        preferred_element_type=jnp.float32) + gk
        sig, tnh = act(gates)
        i = sig[:, 0:H2]                                # [i1, i2]
        f = sig[:, H2:2 * H2]                           # [f1, f2]
        g = tnh[:, 2 * H2:3 * H2]                       # [g1, g2]
        o = sig[:, 3 * H2:4 * H2]                       # [o1, o2]
        cpk = f * cpk + i * g                           # [c1(k), c2(k-1)]
        hcat = o * jnp.tanh(cpk)                        # [h1(k), h2(k-1)]
        return hcat, cpk

    # Cap unroll so large T doesn't blow up code size / vreg pressure.
    unroll = int(min(max(T - 1, 1), 8))
    hcat, cpk = jax.lax.fori_loop(1, T, step, (hcat0, cpk0), unroll=unroll)

    # ---- Drain: final layer-2 step -> h2(T-1). ------------------------------
    gates = jnp.dot(hcat, wbig, preferred_element_type=jnp.float32) + bias
    sig, tnh = act(gates)
    c2 = (sig[:, 3 * H:4 * H] * cpk[:, H:H2]            # f2 * c2(T-2)
          + sig[:, H:2 * H] * tnh[:, 5 * H:6 * H])      # i2 * g2
    h2 = sig[:, 7 * H:8 * H] * jnp.tanh(c2)             # o2 * tanh(c2)

    # Final fc (H -> 1) as VPU multiply + lane reduce (no N=1 MXU pass).
    out_ref[...] = (jnp.sum(h2 * wfc_ref[...], axis=-1, keepdims=True)
                    + bfc_ref[...])


def _interleave_gates(a, b, H):
    """[i,f,g,o] blocks of a and b -> [i_a,i_b,f_a,f_b,g_a,g_b,o_a,o_b]."""
    lead = a.shape[:-1]
    sa = a.reshape(lead + (4, 1, H))
    sb = b.reshape(lead + (4, 1, H))
    return jnp.concatenate([sa, sb], axis=-2).reshape(lead + (8 * H,))


def temp_lstm_forward(x, params, hidden_size):
    """x: (B, T, input_size) float32 -> (B, 1) float32."""
    B, T, In = x.shape
    H = hidden_size
    Bp = max(((B + 7) // 8) * 8, 8)               # pad batch to sublane width

    # Time-major, batch-padded, flattened for the hoisted projection.
    x_tbi = jnp.transpose(x, (1, 0, 2))           # (T, B, In)
    x_pad = jnp.pad(x_tbi, ((0, 0), (0, Bp - B), (0, 0)))
    x2d = x_pad.reshape(T * Bp, In)

    zeros_h4 = jnp.zeros((H, 4 * H), jnp.float32)
    # Skewed fused recurrent weights (2H, 8H): rows 0:H multiply h1(k-1),
    # rows H:2H multiply h2(k-2); columns are the interleaved gate layout.
    w_big = _interleave_gates(
        jnp.concatenate([params["whh1T"], zeros_h4], axis=0),          # layer 1
        jnp.concatenate([params["wih2T"], params["whh2T"]], axis=0),   # layer 2
        H)
    # Layer-1 input weights scattered into the interleaved layout (layer-2
    # column blocks zero -> the prologue fills them with just b2).
    wih1_big = _interleave_gates(
        params["wih1T"], jnp.zeros((In, 4 * H), jnp.float32), H)       # (In, 8H)
    bias_big = _interleave_gates(params["b1"], params["b2"], H)        # (1, 8H)

    kernel = functools.partial(temp_lstm_kernel, hidden_size=H,
                               seq_len=T, batch_pad=Bp)
    vmem = lambda: pl.BlockSpec(memory_space=pltpu.MemorySpace.VMEM)

    # Explicit VMEM budget (v5e scoped default is only 16 MiB).
    resident = 4 * (T * Bp * (8 * H + In) + (In + 2 * H + 2) * 8 * H
                    + H + 2 + Bp)
    vmem_limit = int(min(max(2 * resident + (4 << 20), 32 << 20), 96 << 20))

    out_pad = pl.pallas_call(
        kernel,
        out_shape=jax.ShapeDtypeStruct((Bp, 1), jnp.float32),
        in_specs=[vmem() for _ in range(6)],
        out_specs=vmem(),
        scratch_shapes=[pltpu.VMEM((T * Bp, 8 * H), jnp.float32)],  # G (interleaved)
        compiler_params=pltpu.CompilerParams(vmem_limit_bytes=vmem_limit),
    )(x2d, wih1_big, w_big, bias_big, params["wfc_row"], params["bfc"])
    return out_pad[:B]


def init_params(key, input_size, hidden_size):
    """Deterministic init mirroring PyTorch shapes (weights stored pre-transposed)."""
    H = hidden_size
    k = 1.0 / jnp.sqrt(jnp.float32(H))
    keys = jax.random.split(key, 9)
    u = lambda kk, shape: jax.random.uniform(kk, shape, jnp.float32, -k, k)
    return {
        # layer 1: W_ih (4H, In) -> stored (In, 4H); b = b_ih + b_hh folded
        "wih1T": u(keys[0], (input_size, 4 * H)),
        "whh1T": u(keys[1], (H, 4 * H)),
        "b1":    u(keys[2], (1, 4 * H)) + u(keys[3], (1, 4 * H)),
        # layer 2: W_ih (4H, H) -> (H, 4H)
        "wih2T": u(keys[4], (H, 4 * H)),
        "whh2T": u(keys[5], (H, 4 * H)),
        "b2":    u(keys[6], (1, 4 * H)) + u(keys[7], (1, 4 * H)),
        # fc: weight (1, H) kept as a row; bias (1, 1)
        "wfc_row": u(keys[8], (1, H)),
        "bfc":     jnp.zeros((1, 1), jnp.float32),
    }


def reference_forward(x, p, H):
    """Pure-JAX reference (same math as nn.LSTM + nn.Linear, unfused weights)."""
    B = x.shape[0]
    hi = jax.lax.Precision.HIGHEST

    def cell(h, c, x_in, wihT, whhT, b):
        gates = (jnp.dot(x_in, wihT, precision=hi)
                 + jnp.dot(h, whhT, precision=hi) + b)
        i = jax.nn.sigmoid(gates[:, 0 * H:1 * H])
        f = jax.nn.sigmoid(gates[:, 1 * H:2 * H])
        g = jnp.tanh(gates[:, 2 * H:3 * H])
        o = jax.nn.sigmoid(gates[:, 3 * H:4 * H])
        c = f * c + i * g
        h = o * jnp.tanh(c)
        return h, c

    def step(carry, x_t):
        h1, c1, h2, c2 = carry
        h1, c1 = cell(h1, c1, x_t, p["wih1T"], p["whh1T"], p["b1"])
        h2, c2 = cell(h2, c2, h1, p["wih2T"], p["whh2T"], p["b2"])
        return (h1, c1, h2, c2), None

    z = jnp.zeros((B, H), jnp.float32)
    (h1, c1, h2, c2), _ = jax.lax.scan(step, (z, z, z, z),
                                       jnp.transpose(x, (1, 0, 2)))
    return jnp.dot(h2, p["wfc_row"].T, precision=hi) + p["bfc"]


if __name__ == "__main__":
    B, T, INPUT_SIZE, HIDDEN = 2, 8, 16, 32  # small shapes; 8H = 256 lanes

    key = jax.random.PRNGKey(0)
    kx, kp = jax.random.split(key)
    x = jax.random.normal(kx, (B, T, INPUT_SIZE), jnp.float32)
    params = init_params(kp, INPUT_SIZE, HIDDEN)

    out = temp_lstm_forward(x, params, HIDDEN)
    out = jax.block_until_ready(out)

    ref = reference_forward(x, params, HIDDEN)
    assert out.shape == (B, 1), out.shape
    assert jnp.allclose(out, ref, atol=3e-5, rtol=3e-5), (out, ref)

    print("KERNEL_OK")
</pallas_src>

<mosaic_0001>
module attributes {stable_mosaic.version = 11 : i64} {
  func.func @temp_lstm_kernel(%arg0: memref<64x16xf32, #tpu.memory_space<vmem>>, %arg1: memref<16x256xf32, #tpu.memory_space<vmem>>, %arg2: memref<64x256xf32, #tpu.memory_space<vmem>>, %arg3: memref<1x256xf32, #tpu.memory_space<vmem>>, %arg4: memref<1x32xf32, #tpu.memory_space<vmem>>, %arg5: memref<1x1xf32, #tpu.memory_space<vmem>>, %arg6: memref<8x1xf32, #tpu.memory_space<vmem>>, %arg7: memref<64x256xf32, #tpu.memory_space<vmem>>) attributes {dimension_semantics = [], scalar_prefetch = 0 : i64, scratch_operands = 1 : i64, tpu.core_type = #tpu.core_type<tc>} {
    %c0 = arith.constant 0 : index
    %c0_0 = arith.constant 0 : index
    %0 = vector.load %arg0[%c0, %c0_0] : memref<64x16xf32, #tpu.memory_space<vmem>>, vector<64x16xf32>
    %c0_1 = arith.constant 0 : index
    %c0_2 = arith.constant 0 : index
    %1 = vector.load %arg1[%c0_1, %c0_2] : memref<16x256xf32, #tpu.memory_space<vmem>>, vector<16x256xf32>
    %cst = arith.constant dense<0.000000e+00> : vector<64x256xf32>
    %2 = tpu.matmul %0, %1, %cst {dimension_numbers = #tpu.dot_dimension_numbers<[1], [0], [0], [1], [0, 0, 1, 1], [], []>} : vector<64x16xf32>, vector<16x256xf32>, vector<64x256xf32> -> vector<64x256xf32>
    %c0_3 = arith.constant 0 : index
    %c0_4 = arith.constant 0 : index
    %3 = vector.load %arg3[%c0_3, %c0_4] : memref<1x256xf32, #tpu.memory_space<vmem>>, vector<1x256xf32>
    %4 = vector.broadcast %3 : vector<1x256xf32> to vector<64x256xf32>
    %5 = arith.addf %2, %4 : vector<64x256xf32>
    %c0_5 = arith.constant 0 : index
    %c0_6 = arith.constant 0 : index
    %6 = vector.load %arg7[%c0_5, %c0_6] : memref<64x256xf32, #tpu.memory_space<vmem>>, vector<64x256xf32>
    tpu.vector_store %arg7[%c0_5, %c0_6], %5 {strides = array<i32>} : memref<64x256xf32, #tpu.memory_space<vmem>>, vector<64x256xf32>,
    %c0_7 = arith.constant 0 : index
    %c0_8 = arith.constant 0 : index
    %7 = vector.load %arg2[%c0_7, %c0_8] : memref<64x256xf32, #tpu.memory_space<vmem>>, vector<64x256xf32>
    %c0_9 = arith.constant 0 : index
    %c0_10 = arith.constant 0 : index
    %8 = vector.load %arg3[%c0_9, %c0_10] : memref<1x256xf32, #tpu.memory_space<vmem>>, vector<1x256xf32>
    %c0_11 = arith.constant 0 : index
    %c0_12 = arith.constant 0 : index
    %9 = vector.load %arg7[%c0_11, %c0_12] : memref<64x256xf32, #tpu.memory_space<vmem>>, vector<8x256xf32>
    %10 = arith.negf %9 : vector<8x256xf32>
    %11 = math.exp %10 : vector<8x256xf32>
    %cst_13 = arith.constant 1.000000e+00 : f32
    %12 = vector.broadcast %cst_13 : f32 to vector<8x256xf32>
    %13 = arith.addf %12, %11 : vector<8x256xf32>
    %14 = arith.divf %12, %13 : vector<8x256xf32>
    %15 = math.tanh %9 : vector<8x256xf32>
    %16 = vector.extract_strided_slice %14 {offsets = [0, 0], sizes = [8, 32], strides = [1, 1]} : vector<8x256xf32> to vector<8x32xf32>
    %17 = vector.extract_strided_slice %15 {offsets = [0, 128], sizes = [8, 32], strides = [1, 1]} : vector<8x256xf32> to vector<8x32xf32>
    %18 = arith.mulf %16, %17 : vector<8x32xf32>
    %19 = vector.extract_strided_slice %14 {offsets = [0, 192], sizes = [8, 32], strides = [1, 1]} : vector<8x256xf32> to vector<8x32xf32>
    %20 = math.tanh %18 : vector<8x32xf32>
    %21 = arith.mulf %19, %20 : vector<8x32xf32>
    %cst_14 = arith.constant 0.000000e+00 : f32
    %22 = vector.broadcast %cst_14 : f32 to vector<8x32xf32>
    %23 = tpu.concatenate %21, %22 in 1 : vector<8x32xf32>, vector<8x32xf32> -> vector<8x64xf32>
    %24 = tpu.concatenate %18, %22 in 1 : vector<8x32xf32>, vector<8x32xf32> -> vector<8x64xf32>
    %c1_i32 = arith.constant 1 : i32
    %c8_i32 = arith.constant 8 : i32
    %25 = arith.muli %c1_i32, %c8_i32 : i32
    %26 = tpu.assume_multiple %25, 8 : i32
    %27 = arith.index_cast %26 : i32 to index
    %c0_15 = arith.constant 0 : index
    %28 = vector.load %arg7[%27, %c0_15] : memref<64x256xf32, #tpu.memory_space<vmem>>, vector<8x256xf32>
    %cst_16 = arith.constant dense<0.000000e+00> : vector<8x256xf32>
    %29 = tpu.matmul %23, %7, %cst_16 {dimension_numbers = #tpu.dot_dimension_numbers<[1], [0], [0], [1], [0, 0, 1, 1], [], []>} : vector<8x64xf32>, vector<64x256xf32>, vector<8x256xf32> -> vector<8x256xf32>
    %30 = arith.addf %29, %28 : vector<8x256xf32>
    %31 = arith.negf %30 : vector<8x256xf32>
    %32 = math.exp %31 : vector<8x256xf32>
    %cst_17 = arith.constant 1.000000e+00 : f32
    %33 = vector.broadcast %cst_17 : f32 to vector<8x256xf32>
    %34 = arith.addf %33, %32 : vector<8x256xf32>
    %35 = arith.divf %33, %34 : vector<8x256xf32>
    %36 = math.tanh %30 : vector<8x256xf32>
    %37 = vector.extract_strided_slice %35 {offsets = [0, 0], sizes = [8, 64], strides = [1, 1]} : vector<8x256xf32> to vector<8x64xf32>
    %38 = vector.extract_strided_slice %35 {offsets = [0, 64], sizes = [8, 64], strides = [1, 1]} : vector<8x256xf32> to vector<8x64xf32>
    %39 = vector.extract_strided_slice %36 {offsets = [0, 128], sizes = [8, 64], strides = [1, 1]} : vector<8x256xf32> to vector<8x64xf32>
    %40 = vector.extract_strided_slice %35 {offsets = [0, 192], sizes = [8, 64], strides = [1, 1]} : vector<8x256xf32> to vector<8x64xf32>
    %41 = arith.mulf %38, %24 : vector<8x64xf32>
    %42 = arith.mulf %37, %39 : vector<8x64xf32>
    %43 = arith.addf %41, %42 : vector<8x64xf32>
    %44 = math.tanh %43 : vector<8x64xf32>
    %45 = arith.mulf %40, %44 : vector<8x64xf32>
    %c2_i32 = arith.constant 2 : i32
    %c8_i32_18 = arith.constant 8 : i32
    %46 = arith.muli %c2_i32, %c8_i32_18 : i32
    %47 = tpu.assume_multiple %46, 8 : i32
    %48 = arith.index_cast %47 : i32 to index
    %c0_19 = arith.constant 0 : index
    %49 = vector.load %arg7[%48, %c0_19] : memref<64x256xf32, #tpu.memory_space<vmem>>, vector<8x256xf32>
    %cst_20 = arith.constant dense<0.000000e+00> : vector<8x256xf32>
    %50 = tpu.matmul %45, %7, %cst_20 {dimension_numbers = #tpu.dot_dimension_numbers<[1], [0], [0], [1], [0, 0, 1, 1], [], []>} : vector<8x64xf32>, vector<64x256xf32>, vector<8x256xf32> -> vector<8x256xf32>
    %51 = arith.addf %50, %49 : vector<8x256xf32>
    %52 = arith.negf %51 : vector<8x256xf32>
    %53 = math.exp %52 : vector<8x256xf32>
    %cst_21 = arith.constant 1.000000e+00 : f32
    %54 = vector.broadcast %cst_21 : f32 to vector<8x256xf32>
    %55 = arith.addf %54, %53 : vector<8x256xf32>
    %56 = arith.divf %54, %55 : vector<8x256xf32>
    %57 = math.tanh %51 : vector<8x256xf32>
    %58 = vector.extract_strided_slice %56 {offsets = [0, 0], sizes = [8, 64], strides = [1, 1]} : vector<8x256xf32> to vector<8x64xf32>
    %59 = vector.extract_strided_slice %56 {offsets = [0, 64], sizes = [8, 64], strides = [1, 1]} : vector<8x256xf32> to vector<8x64xf32>
    %60 = vector.extract_strided_slice %57 {offsets = [0, 128], sizes = [8, 64], strides = [1, 1]} : vector<8x256xf32> to vector<8x64xf32>
    %61 = vector.extract_strided_slice %56 {offsets = [0, 192], sizes = [8, 64], strides = [1, 1]} : vector<8x256xf32> to vector<8x64xf32>
    %62 = arith.mulf %59, %43 : vector<8x64xf32>
    %63 = arith.mulf %58, %60 : vector<8x64xf32>
    %64 = arith.addf %62, %63 : vector<8x64xf32>
    %65 = math.tanh %64 : vector<8x64xf32>
    %66 = arith.mulf %61, %65 : vector<8x64xf32>
    %c3_i32 = arith.constant 3 : i32
    %c8_i32_22 = arith.constant 8 : i32
    %67 = arith.muli %c3_i32, %c8_i32_22 : i32
    %68 = tpu.assume_multiple %67, 8 : i32
    %69 = arith.index_cast %68 : i32 to index
    %c0_23 = arith.constant 0 : index
    %70 = vector.load %arg7[%69, %c0_23] : memref<64x256xf32, #tpu.memory_space<vmem>>, vector<8x256xf32>
    %cst_24 = arith.constant dense<0.000000e+00> : vector<8x256xf32>
    %71 = tpu.matmul %66, %7, %cst_24 {dimension_numbers = #tpu.dot_dimension_numbers<[1], [0], [0], [1], [0, 0, 1, 1], [], []>} : vector<8x64xf32>, vector<64x256xf32>, vector<8x256xf32> -> vector<8x256xf32>
    %72 = arith.addf %71, %70 : vector<8x256xf32>
    %73 = arith.negf %72 : vector<8x256xf32>
    %74 = math.exp %73 : vector<8x256xf32>
    %cst_25 = arith.constant 1.000000e+00 : f32
    %75 = vector.broadcast %cst_25 : f32 to vector<8x256xf32>
    %76 = arith.addf %75, %74 : vector<8x256xf32>
    %77 = arith.divf %75, %76 : vector<8x256xf32>
    %78 = math.tanh %72 : vector<8x256xf32>
    %79 = vector.extract_strided_slice %77 {offsets = [0, 0], sizes = [8, 64], strides = [1, 1]} : vector<8x256xf32> to vector<8x64xf32>
    %80 = vector.extract_strided_slice %77 {offsets = [0, 64], sizes = [8, 64], strides = [1, 1]} : vector<8x256xf32> to vector<8x64xf32>
    %81 = vector.extract_strided_slice %78 {offsets = [0, 128], sizes = [8, 64], strides = [1, 1]} : vector<8x256xf32> to vector<8x64xf32>
    %82 = vector.extract_strided_slice %77 {offsets = [0, 192], sizes = [8, 64], strides = [1, 1]} : vector<8x256xf32> to vector<8x64xf32>
    %83 = arith.mulf %80, %64 : vector<8x64xf32>
    %84 = arith.mulf %79, %81 : vector<8x64xf32>
    %85 = arith.addf %83, %84 : vector<8x64xf32>
    %86 = math.tanh %85 : vector<8x64xf32>
    %87 = arith.mulf %82, %86 : vector<8x64xf32>
    %c4_i32 = arith.constant 4 : i32
    %c8_i32_26 = arith.constant 8 : i32
    %88 = arith.muli %c4_i32, %c8_i32_26 : i32
    %89 = tpu.assume_multiple %88, 8 : i32
    %90 = arith.index_cast %89 : i32 to index
    %c0_27 = arith.constant 0 : index
    %91 = vector.load %arg7[%90, %c0_27] : memref<64x256xf32, #tpu.memory_space<vmem>>, vector<8x256xf32>
    %cst_28 = arith.constant dense<0.000000e+00> : vector<8x256xf32>
    %92 = tpu.matmul %87, %7, %cst_28 {dimension_numbers = #tpu.dot_dimension_numbers<[1], [0], [0], [1], [0, 0, 1, 1], [], []>} : vector<8x64xf32>, vector<64x256xf32>, vector<8x256xf32> -> vector<8x256xf32>
    %93 = arith.addf %92, %91 : vector<8x256xf32>
    %94 = arith.negf %93 : vector<8x256xf32>
    %95 = math.exp %94 : vector<8x256xf32>
    %cst_29 = arith.constant 1.000000e+00 : f32
    %96 = vector.broadcast %cst_29 : f32 to vector<8x256xf32>
    %97 = arith.addf %96, %95 : vector<8x256xf32>
    %98 = arith.divf %96, %97 : vector<8x256xf32>
    %99 = math.tanh %93 : vector<8x256xf32>
    %100 = vector.extract_strided_slice %98 {offsets = [0, 0], sizes = [8, 64], strides = [1, 1]} : vector<8x256xf32> to vector<8x64xf32>
    %101 = vector.extract_strided_slice %98 {offsets = [0, 64], sizes = [8, 64], strides = [1, 1]} : vector<8x256xf32> to vector<8x64xf32>
    %102 = vector.extract_strided_slice %99 {offsets = [0, 128], sizes = [8, 64], strides = [1, 1]} : vector<8x256xf32> to vector<8x64xf32>
    %103 = vector.extract_strided_slice %98 {offsets = [0, 192], sizes = [8, 64], strides = [1, 1]} : vector<8x256xf32> to vector<8x64xf32>
    %104 = arith.mulf %101, %85 : vector<8x64xf32>
    %105 = arith.mulf %100, %102 : vector<8x64xf32>
    %106 = arith.addf %104, %105 : vector<8x64xf32>
    %107 = math.tanh %106 : vector<8x64xf32>
    %108 = arith.mulf %103, %107 : vector<8x64xf32>
    %c5_i32 = arith.constant 5 : i32
    %c8_i32_30 = arith.constant 8 : i32
    %109 = arith.muli %c5_i32, %c8_i32_30 : i32
    %110 = tpu.assume_multiple %109, 8 : i32
    %111 = arith.index_cast %110 : i32 to index
    %c0_31 = arith.constant 0 : index
    %112 = vector.load %arg7[%111, %c0_31] : memref<64x256xf32, #tpu.memory_space<vmem>>, vector<8x256xf32>
    %cst_32 = arith.constant dense<0.000000e+00> : vector<8x256xf32>
    %113 = tpu.matmul %108, %7, %cst_32 {dimension_numbers = #tpu.dot_dimension_numbers<[1], [0], [0], [1], [0, 0, 1, 1], [], []>} : vector<8x64xf32>, vector<64x256xf32>, vector<8x256xf32> -> vector<8x256xf32>
    %114 = arith.addf %113, %112 : vector<8x256xf32>
    %115 = arith.negf %114 : vector<8x256xf32>
    %116 = math.exp %115 : vector<8x256xf32>
    %cst_33 = arith.constant 1.000000e+00 : f32
    %117 = vector.broadcast %cst_33 : f32 to vector<8x256xf32>
    %118 = arith.addf %117, %116 : vector<8x256xf32>
    %119 = arith.divf %117, %118 : vector<8x256xf32>
    %120 = math.tanh %114 : vector<8x256xf32>
    %121 = vector.extract_strided_slice %119 {offsets = [0, 0], sizes = [8, 64], strides = [1, 1]} : vector<8x256xf32> to vector<8x64xf32>
    %122 = vector.extract_strided_slice %119 {offsets = [0, 64], sizes = [8, 64], strides = [1, 1]} : vector<8x256xf32> to vector<8x64xf32>
    %123 = vector.extract_strided_slice %120 {offsets = [0, 128], sizes = [8, 64], strides = [1, 1]} : vector<8x256xf32> to vector<8x64xf32>
    %124 = vector.extract_strided_slice %119 {offsets = [0, 192], sizes = [8, 64], strides = [1, 1]} : vector<8x256xf32> to vector<8x64xf32>
    %125 = arith.mulf %122, %106 : vector<8x64xf32>
    %126 = arith.mulf %121, %123 : vector<8x64xf32>
    %127 = arith.addf %125, %126 : vector<8x64xf32>
    %128 = math.tanh %127 : vector<8x64xf32>
    %129 = arith.mulf %124, %128 : vector<8x64xf32>
    %c6_i32 = arith.constant 6 : i32
    %c8_i32_34 = arith.constant 8 : i32
    %130 = arith.muli %c6_i32, %c8_i32_34 : i32
    %131 = tpu.assume_multiple %130, 8 : i32
    %132 = arith.index_cast %131 : i32 to index
    %c0_35 = arith.constant 0 : index
    %133 = vector.load %arg7[%132, %c0_35] : memref<64x256xf32, #tpu.memory_space<vmem>>, vector<8x256xf32>
    %cst_36 = arith.constant dense<0.000000e+00> : vector<8x256xf32>
    %134 = tpu.matmul %129, %7, %cst_36 {dimension_numbers = #tpu.dot_dimension_numbers<[1], [0], [0], [1], [0, 0, 1, 1], [], []>} : vector<8x64xf32>, vector<64x256xf32>, vector<8x256xf32> -> vector<8x256xf32>
    %135 = arith.addf %134, %133 : vector<8x256xf32>
    %136 = arith.negf %135 : vector<8x256xf32>
    %137 = math.exp %136 : vector<8x256xf32>
    %cst_37 = arith.constant 1.000000e+00 : f32
    %138 = vector.broadcast %cst_37 : f32 to vector<8x256xf32>
    %139 = arith.addf %138, %137 : vector<8x256xf32>
    %140 = arith.divf %138, %139 : vector<8x256xf32>
    %141 = math.tanh %135 : vector<8x256xf32>
    %142 = vector.extract_strided_slice %140 {offsets = [0, 0], sizes = [8, 64], strides = [1, 1]} : vector<8x256xf32> to vector<8x64xf32>
    %143 = vector.extract_strided_slice %140 {offsets = [0, 64], sizes = [8, 64], strides = [1, 1]} : vector<8x256xf32> to vector<8x64xf32>
    %144 = vector.extract_strided_slice %141 {offsets = [0, 128], sizes = [8, 64], strides = [1, 1]} : vector<8x256xf32> to vector<8x64xf32>
    %145 = vector.extract_strided_slice %140 {offsets = [0, 192], sizes = [8, 64], strides = [1, 1]} : vector<8x256xf32> to vector<8x64xf32>
    %146 = arith.mulf %143, %127 : vector<8x64xf32>
    %147 = arith.mulf %142, %144 : vector<8x64xf32>
    %148 = arith.addf %146, %147 : vector<8x64xf32>
    %149 = math.tanh %148 : vector<8x64xf32>
    %150 = arith.mulf %145, %149 : vector<8x64xf32>
    %c7_i32 = arith.constant 7 : i32
    %c8_i32_38 = arith.constant 8 : i32
    %151 = arith.muli %c7_i32, %c8_i32_38 : i32
    %152 = tpu.assume_multiple %151, 8 : i32
    %153 = arith.index_cast %152 : i32 to index
    %c0_39 = arith.constant 0 : index
    %154 = vector.load %arg7[%153, %c0_39] : memref<64x256xf32, #tpu.memory_space<vmem>>, vector<8x256xf32>
    %cst_40 = arith.constant dense<0.000000e+00> : vector<8x256xf32>
    %155 = tpu.matmul %150, %7, %cst_40 {dimension_numbers = #tpu.dot_dimension_numbers<[1], [0], [0], [1], [0, 0, 1, 1], [], []>} : vector<8x64xf32>, vector<64x256xf32>, vector<8x256xf32> -> vector<8x256xf32>
    %156 = arith.addf %155, %154 : vector<8x256xf32>
    %157 = arith.negf %156 : vector<8x256xf32>
    %158 = math.exp %157 : vector<8x256xf32>
    %cst_41 = arith.constant 1.000000e+00 : f32
    %159 = vector.broadcast %cst_41 : f32 to vector<8x256xf32>
    %160 = arith.addf %159, %158 : vector<8x256xf32>
    %161 = arith.divf %159, %160 : vector<8x256xf32>
    %162 = math.tanh %156 : vector<8x256xf32>
    %163 = vector.extract_strided_slice %161 {offsets = [0, 0], sizes = [8, 64], strides = [1, 1]} : vector<8x256xf32> to vector<8x64xf32>
    %164 = vector.extract_strided_slice %161 {offsets = [0, 64], sizes = [8, 64], strides = [1, 1]} : vector<8x256xf32> to vector<8x64xf32>
    %165 = vector.extract_strided_slice %162 {offsets = [0, 128], sizes = [8, 64], strides = [1, 1]} : vector<8x256xf32> to vector<8x64xf32>
    %166 = vector.extract_strided_slice %161 {offsets = [0, 192], sizes = [8, 64], strides = [1, 1]} : vector<8x256xf32> to vector<8x64xf32>
    %167 = arith.mulf %164, %148 : vector<8x64xf32>
    %168 = arith.mulf %163, %165 : vector<8x64xf32>
    %169 = arith.addf %167, %168 : vector<8x64xf32>
    %170 = math.tanh %169 : vector<8x64xf32>
    %171 = arith.mulf %166, %170 : vector<8x64xf32>
    %c7_i32_42 = arith.constant 7 : i32
    %cst_43 = arith.constant dense<0.000000e+00> : vector<8x256xf32>
    %172 = tpu.matmul %171, %7, %cst_43 {dimension_numbers = #tpu.dot_dimension_numbers<[1], [0], [0], [1], [0, 0, 1, 1], [], []>} : vector<8x64xf32>, vector<64x256xf32>, vector<8x256xf32> -> vector<8x256xf32>
    %173 = vector.broadcast %8 : vector<1x256xf32> to vector<8x256xf32>
    %174 = arith.addf %172, %173 : vector<8x256xf32>
    %175 = arith.negf %174 : vector<8x256xf32>
    %176 = math.exp %175 : vector<8x256xf32>
    %cst_44 = arith.constant 1.000000e+00 : f32
    %177 = vector.broadcast %cst_44 : f32 to vector<8x256xf32>
    %178 = arith.addf %177, %176 : vector<8x256xf32>
    %179 = arith.divf %177, %178 : vector<8x256xf32>
    %180 = math.tanh %174 : vector<8x256xf32>
    %181 = vector.extract_strided_slice %179 {offsets = [0, 96], sizes = [8, 32], strides = [1, 1]} : vector<8x256xf32> to vector<8x32xf32>
    %182 = vector.extract_strided_slice %169 {offsets = [0, 32], sizes = [8, 32], strides = [1, 1]} : vector<8x64xf32> to vector<8x32xf32>
    %183 = arith.mulf %181, %182 : vector<8x32xf32>
    %184 = vector.extract_strided_slice %179 {offsets = [0, 32], sizes = [8, 32], strides = [1, 1]} : vector<8x256xf32> to vector<8x32xf32>
    %185 = vector.extract_strided_slice %180 {offsets = [0, 160], sizes = [8, 32], strides = [1, 1]} : vector<8x256xf32> to vector<8x32xf32>
    %186 = arith.mulf %184, %185 : vector<8x32xf32>
    %187 = arith.addf %183, %186 : vector<8x32xf32>
    %188 = vector.extract_strided_slice %179 {offsets = [0, 224], sizes = [8, 32], strides = [1, 1]} : vector<8x256xf32> to vector<8x32xf32>
    %189 = math.tanh %187 : vector<8x32xf32>
    %190 = arith.mulf %188, %189 : vector<8x32xf32>
    %c0_45 = arith.constant 0 : index
    %c0_46 = arith.constant 0 : index
    %191 = vector.load %arg4[%c0_45, %c0_46] : memref<1x32xf32, #tpu.memory_space<vmem>>, vector<1x32xf32>
    %192 = vector.broadcast %191 : vector<1x32xf32> to vector<8x32xf32>
    %193 = arith.mulf %190, %192 : vector<8x32xf32>
    %cst_47 = arith.constant dense<0.000000e+00> : vector<8xf32>
    %194 = vector.multi_reduction <add>, %193, %cst_47 [1] : vector<8x32xf32> to vector<8xf32>
    %195 = vector.shape_cast %194 : vector<8xf32> to vector<8x1xf32>
    %c0_48 = arith.constant 0 : index
    %c0_49 = arith.constant 0 : index
    %196 = vector.load %arg5[%c0_48, %c0_49] : memref<1x1xf32, #tpu.memory_space<vmem>>, vector<1x1xf32>
    %197 = vector.broadcast %196 : vector<1x1xf32> to vector<8x1xf32>
    %198 = arith.addf %195, %197 : vector<8x1xf32>
    %c0_50 = arith.constant 0 : index
    %c0_51 = arith.constant 0 : index
    %199 = vector.load %arg6[%c0_50, %c0_51] : memref<8x1xf32, #tpu.memory_space<vmem>>, vector<8x1xf32>
    tpu.vector_store %arg6[%c0_50, %c0_51], %198 {strides = array<i32>} : memref<8x1xf32, #tpu.memory_space<vmem>>, vector<8x1xf32>,
    return
  }
}

</mosaic_0001>

<bundles_post_ra>
// kernel: tpu_custom_call.1
= control target key start
LH: loop header
LB: loop body
LE: loop exit
PB: predicated region body
PF: predicated region fallthrough
CT: control target
= control target key end

     0   :  { %s1618_s0 = inlined_call_operand.vmem [shape: f32[64,16], index: 0, kind: input, shape index: {}]   ;;  %s1619_s1 = inlined_call_operand.vmem [shape: f32[16,256], index: 1, kind: input, shape index: {}]   ;;  %s1620_s2 = inlined_call_operand.hbm [shape: f32[64,256], index: 2, kind: input, shape index: {}]   ;;  %s1621_s3 = inlined_call_operand.vmem [shape: f32[1,256], index: 3, kind: input, shape index: {}]   ;;  %s1622_s4 = inlined_call_operand.vmem [shape: f32[1,32], index: 4, kind: input, shape index: {}]   ;;  %s1623_s5 = inlined_call_operand.<no memory space> [shape: f32[1,1], index: 5, kind: input, shape index: {}]   ;;  %s1624_s6 = inlined_call_operand.vmem [shape: f32[8,1], index: 6, kind: output, shape index: {}]  }
   0x1   :  { %v11_v0 = vstv %s1623_s5 }
   0x2   :  { %12 = vst [vmem:[#allocation3] sm:$0x1] %v11_v0 }
   0x3   :  { %13 = vsyncpa [#allocation5], 0  ;;  %s22_s25 = sshll.u32 %s1620_s2, 4  ;;  %s1266_s26 = smov [#allocation4]   ;;  %s23_s25 = int_to_ptr.hbm [resolvable:$true] %s22_s25 }
   0x4   :  { %s24_s27 = sshll.u32 %s1266_s26, 4  ;;  %s1267_s28 = smov 256   ;;  %s25_s27 = int_to_ptr.vmem [resolvable:$true] %s24_s27 }
   0x5   :  { %s1268_s29 = smov 16  }
   0x6   :  { %30 = dma.hbm_to_vmem [thread:$0]  %s23_s25, 2048, %s25_s27, [#allocation5], %s1267_s28, %s1267_s28, %s1268_s29  }
   0x7   :  { %1264 = dma.done.wait [#allocation5], 2048  }
   0x8   :  { %1265 = vsyncadd [#allocation5], 4294965248  ;;  %v51_v1 = vld [vmem:[%s1619_s1 + $0x10] sm:$0xff]  ;;  %v49_v2 = vld [vmem:[%s1619_s1] sm:$0xff]  ;;  %vm59_vm0 = vcmask 130048   ;;  %vm251_vm5 = vcmask 261120  }
   0x9   :  { %98 = vmatpush.msra.mxu0 %v51_v1  ;;  %v41_v3 = vld [vmem:[%s1618_s0] sm:$0xff]  ;;  %v52_v4 = vld [vmem:[%s1619_s1 + $0x18] sm:$0xff]  ;;  %v50_v5 = vld [vmem:[%s1619_s1 + $0x8] sm:$0xff]  ;;  %s1269_s1 = smov 64   ;;  %vm259_vm10 = vcmask 523264   ;;  %s1270_s7 = smov 96  }
   0xa   :  { %139 = vmatpush.msra.mxu1 %v52_v4  ;;  %v53_v6 = vld [vmem:[%s1621_s3] sm:$0x3]  ;;  %v1342_v33 = vld [vmem:[#allocation4 + $0x70] sm:$0xff]  ;;  %v1350_v36 = vld [vmem:[#allocation4 + $0x68] sm:$0xff] }
   0xb   :  { %99 = vmatpush.msra.mxu0 %v49_v2  ;;  %v1333_v7 = vperm.slane %v53_v6, 0  ;;  %v1336_v13 = vperm.slane %v53_v6, 1  ;;  %v1344_v34 = vld [vmem:[#allocation4 + $0x78] sm:$0xff]  ;;  %v1346_v35 = vld [vmem:[#allocation4 + $0x60] sm:$0xff]  ;;  %271 = vmatpush.msra.mxu2 %v1342_v33  ;;  %v1352_v37 = vld [vmem:[#allocation4 + $0x50] sm:$0xff] }
   0xc   :  { %1074 = vmatmul.msk.f32.vlgmr.msra.gmra.mxu0 %vm59_vm0, %v41_v3  ;;  %140 = vmatpush.msra.mxu1 %v50_v5  ;;  %v1354_v38 = vld [vmem:[#allocation4 + $0x58] sm:$0xff]  ;;  %v1360_v39 = vld [vmem:[#allocation4 + $0x40] sm:$0xff]  ;;  %v1362_v40 = vld [vmem:[#allocation4 + $0x48] sm:$0xff] }
   0xd   :  { %1082 = vmatmul.msk.f32.vlgmr.msra.gmra.mxu1 %vm59_vm0, %v41_v3  ;;  %291 = vmatpush.msra.mxu3 %v1344_v34  ;;  %v1368_v41 = vld [vmem:[#allocation4 + $0x30] sm:$0xff]  ;;  %v1370_v42 = vld [vmem:[#allocation4 + $0x38] sm:$0xff]  ;;  %v1376_v44 = vld [vmem:[#allocation4 + $0x20] sm:$0xff] }
   0xe   :  { %667 = vmatpush.msrb.mxu0 %v1342_v33  ;;  %687 = vmatpush.msrb.mxu1 %v1344_v34  ;;  %v1378_v45 = vld [vmem:[#allocation4 + $0x28] sm:$0xff]  ;;  %v1384_v47 = vld [vmem:[#allocation4 + $0x10] sm:$0xff]  ;;  %v1386_v48 = vld [vmem:[#allocation4 + $0x18] sm:$0xff] }
   0xf   :  { %272 = vmatpush.msra.mxu2 %v1346_v35  ;;  %292 = vmatpush.msra.mxu3 %v1350_v36  ;;  %v1399_v59 = vld [vmem:[#allocation4] sm:$0xff]  ;;  %v1401_v60 = vld [vmem:[#allocation4 + $0x8] sm:$0xff] }
  0x10   :  { %668 = vmatpush.msrb.mxu0 %v1346_v35  ;;  %688 = vmatpush.msrb.mxu1 %v1350_v36  ;;  %v42_v61 = vld [vmem:[%s1618_s0 + $0x8] sm:$0xff] }
  0x11   :  { %273 = vmatpush.msra.mxu2 %v1352_v37  ;;  %293 = vmatpush.msra.mxu3 %v1354_v38 }
  0x12   :  { %669 = vmatpush.msrb.mxu0 %v1352_v37  ;;  %689 = vmatpush.msrb.mxu1 %v1354_v38 }
  0x13   :  { %274 = vmatpush.msra.mxu2 %v1360_v39  ;;  %294 = vmatpush.msra.mxu3 %v1362_v40 }
  0x14   :  { %670 = vmatpush.msrb.mxu0 %v1360_v39  ;;  %690 = vmatpush.msrb.mxu1 %v1362_v40 }
  0x15   :  { %275 = vmatpush.msra.mxu2 %v1368_v41  ;;  %295 = vmatpush.msra.mxu3 %v1370_v42 }
  0x16   :  { %671 = vmatpush.msrb.mxu0 %v1368_v41  ;;  %691 = vmatpush.msrb.mxu1 %v1370_v42 }
  0x17   :  { %276 = vmatpush.msra.mxu2 %v1376_v44  ;;  %296 = vmatpush.msra.mxu3 %v1378_v45 }
  0x18   :  { %672 = vmatpush.msrb.mxu0 %v1376_v44  ;;  %692 = vmatpush.msrb.mxu1 %v1378_v45 }
  0x19   :  { %277 = vmatpush.msra.mxu2 %v1384_v47  ;;  %297 = vmatpush.msra.mxu3 %v1386_v48 }
  0x1a   :  { %673 = vmatpush.msrb.mxu0 %v1384_v47  ;;  %693 = vmatpush.msrb.mxu1 %v1386_v48 }
  0x1b   :  { %278 = vmatpush.msra.mxu2 %v1399_v59  ;;  %298 = vmatpush.msra.mxu3 %v1401_v60 }
  0x1c   :  { %1075 = vmatmul.msk.f32.gmra.mxu0 %vm59_vm0, %v42_v61  ;;  %1083 = vmatmul.msk.f32.gmra.mxu1 %vm59_vm0, %v42_v61 }
  0x1d   :  { %373 = vmatpush.msrb.mxu2 %v1342_v33  ;;  %393 = vmatpush.msrb.mxu3 %v1344_v34 }
  0x1e   :  { %674 = vmatpush.msrb.mxu0 %v1399_v59  ;;  %694 = vmatpush.msrb.mxu1 %v1401_v60 }
  0x1f   :  { %374 = vmatpush.msrb.mxu2 %v1346_v35  ;;  %394 = vmatpush.msrb.mxu3 %v1350_v36 }
  0x20   :  { %863 = vmatpush.msra.mxu0 %v1342_v33  ;;  %883 = vmatpush.msra.mxu1 %v1344_v34 }
  0x21   :  { %375 = vmatpush.msrb.mxu2 %v1352_v37  ;;  %395 = vmatpush.msrb.mxu3 %v1354_v38 }
  0x22   :  { %864 = vmatpush.msra.mxu0 %v1346_v35  ;;  %884 = vmatpush.msra.mxu1 %v1350_v36 }
  0x23   :  { %376 = vmatpush.msrb.mxu2 %v1360_v39  ;;  %396 = vmatpush.msrb.mxu3 %v1362_v40 }
  0x24   :  { %865 = vmatpush.msra.mxu0 %v1352_v37  ;;  %885 = vmatpush.msra.mxu1 %v1354_v38 }
  0x25   :  { %377 = vmatpush.msrb.mxu2 %v1368_v41  ;;  %397 = vmatpush.msrb.mxu3 %v1370_v42 }
  0x26   :  { %866 = vmatpush.msra.mxu0 %v1360_v39  ;;  %886 = vmatpush.msra.mxu1 %v1362_v40 }
  0x27   :  { %378 = vmatpush.msrb.mxu2 %v1376_v44  ;;  %398 = vmatpush.msrb.mxu3 %v1378_v45 }
  0x28   :  { %867 = vmatpush.msra.mxu0 %v1368_v41  ;;  %887 = vmatpush.msra.mxu1 %v1370_v42 }
  0x29   :  { %379 = vmatpush.msrb.mxu2 %v1384_v47  ;;  %399 = vmatpush.msrb.mxu3 %v1386_v48 }
  0x2a   :  { %868 = vmatpush.msra.mxu0 %v1376_v44  ;;  %888 = vmatpush.msra.mxu1 %v1378_v45 }
  0x2b   :  { %380 = vmatpush.msrb.mxu2 %v1399_v59  ;;  %400 = vmatpush.msrb.mxu3 %v1401_v60 }
  0x2c   :  { %869 = vmatpush.msra.mxu0 %v1384_v47  ;;  %889 = vmatpush.msra.mxu1 %v1386_v48 }
  0x2e   :  { %870 = vmatpush.msra.mxu0 %v1399_v59  ;;  %890 = vmatpush.msra.mxu1 %v1401_v60 }
  0x89   :  { %v101_v8 = vpop.f32.mrf.mxu0 }
  0x8a   :  { %v102_v9 = vadd.f32 %v101_v8, %v1333_v7  ;;  %v142_v14 = vpop.f32.mrf.mxu1 }
  0x8b   :  { %v143_v16 = vadd.f32 %v142_v14, %v1336_v13 }
  0x8c   :  { %v1090_v10 = vmul.f32 -1.442695, %v102_v9 }
  0x8d   :  { %v1091_v30 = vmul.f32 -1.442695, %v143_v16 }
  0x8e   :  { %1132 = vpow2.f32 %v1090_v10 }
  0x94   :  { %v1133_v11 = vpop.eup %1132 }
  0x95   :  { %v207_v12 = vadd.f32 1.0, %v1133_v11 }
  0x97   :  { %1134 = vrcp.f32 %v207_v12  ;;  %v220_v19 = vand.u32 2147483648, %v207_v12  ;;  %v218_v21 = vand.u32 2147483647, %v207_v12  ;;  %vm214_vm2 = vweird.f32 %v207_v12 }
  0x98   :  { %1136 = vtanh.f32 %v143_v16 }
  0x99   :  { %v221_v24 = vor.u32 1.1754944e-38, %v220_v19  ;;  %vm219_vm4 = vcmp.eq.f32.partialorder %v218_v21, 8.507059e+37  ;;  %v104_v0 = vpop.f32.mrf.mxu0  ;;  %v145_v8 = vpop.f32.mrf.mxu1 }
  0x9a   :  { %v105_v1 = vadd.f32 %v104_v0, %v1333_v7  ;;  %v146_v9 = vadd.f32 %v145_v8, %v1336_v13 }
  0x9d   :  { %v1135_v15 = vpop.eup %1134 }
  0x9e   :  { %v210_v17 = vmul.f32 %v1135_v15, %v207_v12  ;;  %vm215_vm1 = vweird.f32 %v1135_v15  ;;  %v1137_v23 = vpop.eup %1136 }
  0x9f   :  { %vm216_vm3 = vmor %vm214_vm2, %vm215_vm1 }
  0xa0   :  { %v211_v18 = vsub.f32 1.0, %v210_v17 }
  0xa2   :  { %v212_v20 = vmul.f32 %v1135_v15, %v211_v18 }
  0xa4   :  { %v213_v22 = vadd.f32 %v1135_v15, %v212_v20 }
  0xa6   :  { %v217_v25 = vsel %vm216_vm3, %v1135_v15, %v213_v22 }
  0xa7   :  { %v222_v26 = vsel %vm219_vm4, %v221_v24, %v217_v25 }
  0xa8   :  { %v240_v27 = vmul.f32 %v1137_v23, %v222_v26 }
  0xaa   :  { %v253_v28 = vsel %vm251_vm5, %v240_v27, 0.0  ;;  %1138 = vtanh.f32 %v240_v27 }
  0xab   :  { %343 = vrot.lane.b32.xlu1 %v253_v28, %s1269_s1  ;;  %1140 = vpow2.f32 %v1091_v30 }
  0xb0   :  { %v1139_v29 = vpop.eup %1138 }
  0xb1   :  { %243 = vrot.lane.b32.xlu0 %v1139_v29, %s1269_s1  ;;  %v1141_v31 = vpop.eup %1140 }
  0xb2   :  { %v208_v32 = vadd.f32 1.0, %v1141_v31 }
  0xb4   :  { %1142 = vrcp.f32 %v208_v32  ;;  %vm229_vm6 = vweird.f32 %v208_v32  ;;  %v235_v51 = vand.u32 2147483648, %v208_v32  ;;  %v233_v53 = vand.u32 2147483647, %v208_v32 }
  0xb6   :  { %v236_v54 = vor.u32 1.1754944e-38, %v235_v51  ;;  %vm234_vm9 = vcmp.eq.f32.partialorder %v233_v53, 8.507059e+37 }
  0xba   :  { %v1143_v43 = vpop.eup %1142 }
  0xbb   :  { %v225_v46 = vmul.f32 %v1143_v43, %v208_v32  ;;  %vm230_vm7 = vweird.f32 %v1143_v43 }
  0xbc   :  { %vm231_vm8 = vmor %vm229_vm6, %vm230_vm7 }
  0xbd   :  { %v226_v49 = vsub.f32 1.0, %v225_v46 }
  0xbf   :  { %v227_v50 = vmul.f32 %v1143_v43, %v226_v49 }
  0xc1   :  { %v228_v52 = vadd.f32 %v1143_v43, %v227_v50 }
  0xc3   :  { %v232_v55 = vsel %vm231_vm8, %v1143_v43, %v228_v52 }
  0xc4   :  { %v237_v56 = vsel %vm234_vm9, %v236_v54, %v232_v55 }
 0x11d   :  { %v344_v30 = vpop.permute.xlu1 %343 }
 0x123   :  { %v244_v57 = vpop.permute.xlu0 %243 }
 0x124   :  { %v246_v58 = vmul.f32 %v244_v57, %v237_v56 }
 0x126   :  { %248 = vrot.lane.b32.xlu0 %v246_v58, %s1269_s1  ;;  %v43_v58 = vld [vmem:[%s1618_s0 + $0x10] sm:$0xff] }
 0x127   :  { %1076 = vmatmul.msk.f32.gmra.mxu0 %vm59_vm0, %v43_v58  ;;  %1084 = vmatmul.msk.f32.gmra.mxu1 %vm59_vm0, %v43_v58 }
 0x198   :  { %v249_v62 = vpop.permute.xlu0 %248 }
 0x199   :  { %v252_v63 = vsel %vm251_vm5, %v249_v62, 0.0 }
 0x19a   :  { %1092 = vmatmul.msk.f32.vlgmr.msra.gmra.mxu2 %vm259_vm10, %v252_v63  ;;  %1093 = vmatmul.msk.f32.vlgmr.msra.gmra.mxu3 %vm259_vm10, %v252_v63 }
 0x19b   :  { %471 = vmatpush.msra.mxu2 %v1342_v33  ;;  %491 = vmatpush.msra.mxu3 %v1344_v34 }
 0x19d   :  { %472 = vmatpush.msra.mxu2 %v1346_v35  ;;  %492 = vmatpush.msra.mxu3 %v1350_v36 }
 0x19f   :  { %473 = vmatpush.msra.mxu2 %v1352_v37  ;;  %493 = vmatpush.msra.mxu3 %v1354_v38 }
 0x1a1   :  { %474 = vmatpush.msra.mxu2 %v1360_v39  ;;  %494 = vmatpush.msra.mxu3 %v1362_v40 }
 0x1a3   :  { %475 = vmatpush.msra.mxu2 %v1368_v41  ;;  %495 = vmatpush.msra.mxu3 %v1370_v42 }
 0x1a4   :  { %v107_v62 = vpop.f32.mrf.mxu0 }
 0x1a5   :  { %476 = vmatpush.msra.mxu2 %v1376_v44  ;;  %496 = vmatpush.msra.mxu3 %v1378_v45  ;;  %v108_v63 = vadd.f32 %v107_v62, %v1333_v7 }
 0x1a7   :  { %477 = vmatpush.msra.mxu2 %v1384_v47  ;;  %497 = vmatpush.msra.mxu3 %v1386_v48 }
 0x1a9   :  { %478 = vmatpush.msra.mxu2 %v1399_v59  ;;  %498 = vmatpush.msra.mxu3 %v1401_v60 }
 0x21d   :  { %v280_v2 = vpop.f32.mrf.mxu2  ;;  %v300_v10 = vpop.f32.mrf.mxu3 }
 0x21e   :  { %v281_v3 = vadd.f32 %v280_v2, %v105_v1  ;;  %v301_v12 = vadd.f32 %v300_v10, %v146_v9 }
 0x220   :  { %v1094_v4 = vmul.f32 -1.442695, %v281_v3  ;;  %v1095_v25 = vmul.f32 -1.442695, %v301_v12 }
 0x222   :  { %1144 = vpow2.f32 %v1094_v4 }
 0x228   :  { %v1145_v5 = vpop.eup %1144 }
 0x229   :  { %v309_v6 = vadd.f32 1.0, %v1145_v5  ;;  %v148_v5 = vpop.f32.mrf.mxu1 }
 0x22b   :  { %1146 = vrcp.f32 %v309_v6  ;;  %v322_v16 = vand.u32 2147483648, %v309_v6  ;;  %v320_v18 = vand.u32 2147483647, %v309_v6  ;;  %vm316_vm12 = vweird.f32 %v309_v6 }
 0x22c   :  { %1148 = vtanh.f32 %v301_v12 }
 0x22d   :  { %v323_v20 = vor.u32 1.1754944e-38, %v322_v16  ;;  %vm321_vm14 = vcmp.eq.f32.partialorder %v320_v18, 8.507059e+37  ;;  %1150 = vpow2.f32 %v1095_v25 }
 0x231   :  { %v1147_v11 = vpop.eup %1146 }
 0x232   :  { %v312_v14 = vmul.f32 %v1147_v11, %v309_v6  ;;  %vm317_vm11 = vweird.f32 %v1147_v11  ;;  %v1149_v22 = vpop.eup %1148  ;;  %v149_v6 = vadd.f32 %v148_v5, %v1336_v13 }
 0x233   :  { %vm318_vm13 = vmor %vm316_vm12, %vm317_vm11  ;;  %v1151_v26 = vpop.eup %1150 }
 0x234   :  { %v313_v15 = vsub.f32 1.0, %v312_v14  ;;  %v310_v27 = vadd.f32 1.0, %v1151_v26 }
 0x236   :  { %v314_v17 = vmul.f32 %v1147_v11, %v313_v15  ;;  %1152 = vrcp.f32 %v310_v27  ;;  %v337_v51 = vand.u32 2147483648, %v310_v27  ;;  %vm331_vm1 = vweird.f32 %v310_v27 }
 0x237   :  { %v335_v52 = vand.u32 2147483647, %v310_v27 }
 0x238   :  { %v315_v19 = vadd.f32 %v1147_v11, %v314_v17  ;;  %v338_v54 = vor.u32 1.1754944e-38, %v337_v51 }
 0x239   :  { %vm336_vm3 = vcmp.eq.f32.partialorder %v335_v52, 8.507059e+37 }
 0x23a   :  { %v319_v21 = vsel %vm318_vm13, %v1147_v11, %v315_v19 }
 0x23b   :  { %v324_v23 = vsel %vm321_vm14, %v323_v20, %v319_v21 }
 0x23c   :  { %v347_v24 = vmul.f32 %v1149_v22, %v324_v23  ;;  %v1153_v28 = vpop.eup %1152  ;;  %v346_v43 = vmul.f32 %v344_v30, %v324_v23 }
 0x23d   :  { %v327_v29 = vmul.f32 %v1153_v28, %v310_v27  ;;  %vm332_vm15 = vweird.f32 %v1153_v28 }
 0x23e   :  { %349 = vrot.lane.b32.xlu1 %v347_v24, %s1269_s1  ;;  %vm333_vm2 = vmor %vm331_vm1, %vm332_vm15 }
 0x23f   :  { %v328_v31 = vsub.f32 1.0, %v327_v29 }
 0x241   :  { %v329_v32 = vmul.f32 %v1153_v28, %v328_v31 }
 0x243   :  { %v330_v50 = vadd.f32 %v1153_v28, %v329_v32 }
 0x245   :  { %v334_v53 = vsel %vm333_vm2, %v1153_v28, %v330_v50 }
 0x246   :  { %v339_v56 = vsel %vm336_vm3, %v338_v54, %v334_v53 }
 0x2b0   :  { %v350_v46 = vpop.permute.xlu1 %349 }
 0x2b1   :  { %v1466_v49 = vadd.f32 %v350_v46, %v346_v43 }
 0x2b3   :  { %1154 = vtanh.f32 %v1466_v49 }
 0x2b9   :  { %v1155_v55 = vpop.eup %1154 }
 0x2ba   :  { %v354_v57 = vmul.f32 %v1155_v55, %v339_v56 }
 0x2bc   :  { %361 = vrot.lane.b32.xlu2 %v354_v57, %s1269_s1 }
 0x316   :  { %v362_v61 = vpop.permute.xlu2 %361 }
 0x317   :  { %1096 = vmatmul.msk.f32.vlgmr.msrb.gmra.mxu2 %vm259_vm10, %v362_v61  ;;  %1097 = vmatmul.msk.f32.vlgmr.msrb.gmra.mxu3 %vm259_vm10, %v362_v61 }
 0x318   :  { %569 = vmatpush.msrb.mxu2 %v1342_v33  ;;  %589 = vmatpush.msrb.mxu3 %v1344_v34 }
 0x31a   :  { %570 = vmatpush.msrb.mxu2 %v1346_v35  ;;  %590 = vmatpush.msrb.mxu3 %v1350_v36 }
 0x31c   :  { %571 = vmatpush.msrb.mxu2 %v1352_v37  ;;  %591 = vmatpush.msrb.mxu3 %v1354_v38 }
 0x31e   :  { %572 = vmatpush.msrb.mxu2 %v1360_v39  ;;  %592 = vmatpush.msrb.mxu3 %v1362_v40 }
 0x320   :  { %573 = vmatpush.msrb.mxu2 %v1368_v41  ;;  %593 = vmatpush.msrb.mxu3 %v1370_v42 }
 0x322   :  { %574 = vmatpush.msrb.mxu2 %v1376_v44  ;;  %594 = vmatpush.msrb.mxu3 %v1378_v45 }
 0x324   :  { %575 = vmatpush.msrb.mxu2 %v1384_v47  ;;  %595 = vmatpush.msrb.mxu3 %v1386_v48 }
 0x326   :  { %576 = vmatpush.msrb.mxu2 %v1399_v59  ;;  %596 = vmatpush.msrb.mxu3 %v1401_v60 }
 0x39a   :  { %v382_v0 = vpop.f32.mrf.mxu2  ;;  %v402_v8 = vpop.f32.mrf.mxu3 }
 0x39b   :  { %v383_v1 = vadd.f32 %v382_v0, %v108_v63  ;;  %v403_v10 = vadd.f32 %v402_v8, %v149_v6 }
 0x39d   :  { %v1098_v2 = vmul.f32 -1.442695, %v383_v1  ;;  %v1099_v23 = vmul.f32 -1.442695, %v403_v10 }
 0x39f   :  { %1156 = vpow2.f32 %v1098_v2 }
 0x3a5   :  { %v1157_v3 = vpop.eup %1156 }
 0x3a6   :  { %v411_v4 = vadd.f32 1.0, %v1157_v3 }
 0x3a8   :  { %1158 = vrcp.f32 %v411_v4  ;;  %v424_v14 = vand.u32 2147483648, %v411_v4  ;;  %v422_v16 = vand.u32 2147483647, %v411_v4  ;;  %vm418_vm6 = vweird.f32 %v411_v4 }
 0x3a9   :  { %1160 = vtanh.f32 %v403_v10 }
 0x3aa   :  { %v425_v18 = vor.u32 1.1754944e-38, %v424_v14  ;;  %vm423_vm8 = vcmp.eq.f32.partialorder %v422_v16, 8.507059e+37  ;;  %1162 = vpow2.f32 %v1099_v23 }
 0x3ae   :  { %v1159_v9 = vpop.eup %1158 }
 0x3af   :  { %v414_v11 = vmul.f32 %v1159_v9, %v411_v4  ;;  %vm419_vm4 = vweird.f32 %v1159_v9  ;;  %v1161_v20 = vpop.eup %1160 }
 0x3b0   :  { %vm420_vm7 = vmor %vm418_vm6, %vm419_vm4  ;;  %v1163_v24 = vpop.eup %1162 }
 0x3b1   :  { %v415_v12 = vsub.f32 1.0, %v414_v11  ;;  %v412_v25 = vadd.f32 1.0, %v1163_v24 }
 0x3b3   :  { %v416_v15 = vmul.f32 %v1159_v9, %v415_v12  ;;  %1164 = vrcp.f32 %v412_v25  ;;  %v439_v46 = vand.u32 2147483648, %v412_v25  ;;  %vm433_vm11 = vweird.f32 %v412_v25 }
 0x3b4   :  { %v437_v50 = vand.u32 2147483647, %v412_v25 }
 0x3b5   :  { %v417_v17 = vadd.f32 %v1159_v9, %v416_v15  ;;  %v440_v52 = vor.u32 1.1754944e-38, %v439_v46 }
 0x3b6   :  { %vm438_vm13 = vcmp.eq.f32.partialorder %v437_v50, 8.507059e+37 }
 0x3b7   :  { %v421_v19 = vsel %vm420_vm7, %v1159_v9, %v417_v17 }
 0x3b8   :  { %v426_v21 = vsel %vm423_vm8, %v425_v18, %v421_v19 }
 0x3b9   :  { %v445_v22 = vmul.f32 %v1161_v20, %v426_v21  ;;  %v1165_v26 = vpop.eup %1164  ;;  %v444_v30 = vmul.f32 %v426_v21, %v1466_v49  ;;  %v44_v49 = vld [vmem:[%s1618_s0 + $0x18] sm:$0xff] }
 0x3ba   :  { %v429_v27 = vmul.f32 %v1165_v26, %v412_v25  ;;  %vm434_vm9 = vweird.f32 %v1165_v26  ;;  %1077 = vmatmul.msk.f32.gmra.mxu0 %vm59_vm0, %v44_v49  ;;  %1085 = vmatmul.msk.f32.gmra.mxu1 %vm59_vm0, %v44_v49 }
 0x3bb   :  { %447 = vrot.lane.b32.xlu2 %v445_v22, %s1269_s1  ;;  %vm435_vm12 = vmor %vm433_vm11, %vm434_vm9 }
 0x3bc   :  { %v430_v28 = vsub.f32 1.0, %v429_v27 }
 0x3be   :  { %v431_v29 = vmul.f32 %v1165_v26, %v430_v28 }
 0x3c0   :  { %v432_v43 = vadd.f32 %v1165_v26, %v431_v29 }
 0x3c2   :  { %v436_v51 = vsel %vm435_vm12, %v1165_v26, %v432_v43 }
 0x3c3   :  { %v441_v54 = vsel %vm438_vm13, %v440_v52, %v436_v51 }
 0x415   :  { %v448_v31 = vpop.permute.xlu2 %447 }
 0x416   :  { %v1497_v32 = vadd.f32 %v448_v31, %v444_v30 }
 0x418   :  { %1166 = vtanh.f32 %v1497_v32 }
 0x41e   :  { %v1167_v53 = vpop.eup %1166 }
 0x41f   :  { %v452_v55 = vmul.f32 %v1167_v53, %v441_v54 }
 0x421   :  { %459 = vrot.lane.b32.xlu0 %v452_v55, %s1269_s1 }
 0x437   :  { %v110_v57 = vpop.f32.mrf.mxu0  ;;  %v151_v2 = vpop.f32.mrf.mxu1 }
 0x438   :  { %v111_v58 = vadd.f32 %v110_v57, %v1333_v7  ;;  %v152_v3 = vadd.f32 %v151_v2, %v1336_v13  ;;  %v46_v2 = vld [vmem:[%s1618_s0 + $0x28] sm:$0xff] }
 0x493   :  { %v460_v56 = vpop.permute.xlu0 %459 }
 0x494   :  { %1100 = vmatmul.msk.f32.vlgmr.msra.gmra.mxu2 %vm259_vm10, %v460_v56  ;;  %1101 = vmatmul.msk.f32.vlgmr.msra.gmra.mxu3 %vm259_vm10, %v460_v56 }
 0x495   :  { %765 = vmatpush.msra.mxu2 %v1342_v33  ;;  %785 = vmatpush.msra.mxu3 %v1344_v34 }
 0x497   :  { %766 = vmatpush.msra.mxu2 %v1346_v35  ;;  %786 = vmatpush.msra.mxu3 %v1350_v36 }
 0x499   :  { %767 = vmatpush.msra.mxu2 %v1352_v37  ;;  %787 = vmatpush.msra.mxu3 %v1354_v38 }
 0x49b   :  { %768 = vmatpush.msra.mxu2 %v1360_v39  ;;  %788 = vmatpush.msra.mxu3 %v1362_v40 }
 0x49d   :  { %769 = vmatpush.msra.mxu2 %v1368_v41  ;;  %789 = vmatpush.msra.mxu3 %v1370_v42 }
 0x49f   :  { %770 = vmatpush.msra.mxu2 %v1376_v44  ;;  %790 = vmatpush.msra.mxu3 %v1378_v45 }
 0x4a1   :  { %771 = vmatpush.msra.mxu2 %v1384_v47  ;;  %791 = vmatpush.msra.mxu3 %v1386_v48 }
 0x4a3   :  { %772 = vmatpush.msra.mxu2 %v1399_v59  ;;  %792 = vmatpush.msra.mxu3 %v1401_v60 }
 0x517   :  { %v480_v61 = vpop.f32.mrf.mxu2  ;;  %v500_v4 = vpop.f32.mrf.mxu3 }
 0x518   :  { %v481_v62 = vadd.f32 %v480_v61, %v111_v58  ;;  %v501_v6 = vadd.f32 %v500_v4, %v152_v3  ;;  %v47_v3 = vld [vmem:[%s1618_s0 + $0x30] sm:$0xff] }
 0x51a   :  { %v1102_v63 = vmul.f32 -1.442695, %v481_v62  ;;  %v1103_v20 = vmul.f32 -1.442695, %v501_v6 }
 0x51c   :  { %1168 = vpow2.f32 %v1102_v63 }
 0x522   :  { %v1169_v0 = vpop.eup %1168 }
 0x523   :  { %v509_v1 = vadd.f32 1.0, %v1169_v0 }
 0x525   :  { %1170 = vrcp.f32 %v509_v1  ;;  %v522_v10 = vand.u32 2147483648, %v509_v1  ;;  %v520_v12 = vand.u32 2147483647, %v509_v1  ;;  %vm516_vm15 = vweird.f32 %v509_v1 }
 0x526   :  { %1172 = vtanh.f32 %v501_v6 }
 0x527   :  { %v523_v15 = vor.u32 1.1754944e-38, %v522_v10  ;;  %vm521_vm2 = vcmp.eq.f32.partialorder %v520_v12, 8.507059e+37  ;;  %1174 = vpow2.f32 %v1103_v20 }
 0x52b   :  { %v1171_v5 = vpop.eup %1170 }
 0x52c   :  { %v512_v8 = vmul.f32 %v1171_v5, %v509_v1  ;;  %vm517_vm14 = vweird.f32 %v1171_v5  ;;  %v1173_v17 = vpop.eup %1172 }
 0x52d   :  { %vm518_vm1 = vmor %vm516_vm15, %vm517_vm14  ;;  %v1175_v21 = vpop.eup %1174 }
 0x52e   :  { %v513_v9 = vsub.f32 1.0, %v512_v8  ;;  %v510_v22 = vadd.f32 1.0, %v1175_v21  ;;  %v48_v8 = vld [vmem:[%s1618_s0 + $0x38] sm:$0xff] }
 0x530   :  { %v514_v11 = vmul.f32 %v1171_v5, %v513_v9  ;;  %1176 = vrcp.f32 %v510_v22  ;;  %v537_v31 = vand.u32 2147483648, %v510_v22  ;;  %vm531_vm4 = vweird.f32 %v510_v22 }
 0x531   :  { %v535_v43 = vand.u32 2147483647, %v510_v22 }
 0x532   :  { %v515_v14 = vadd.f32 %v1171_v5, %v514_v11  ;;  %v538_v50 = vor.u32 1.1754944e-38, %v537_v31 }
 0x533   :  { %vm536_vm7 = vcmp.eq.f32.partialorder %v535_v43, 8.507059e+37 }
 0x534   :  { %v519_v16 = vsel %vm518_vm1, %v1171_v5, %v515_v14 }
 0x535   :  { %v524_v18 = vsel %vm521_vm2, %v523_v15, %v519_v16 }
 0x536   :  { %v543_v19 = vmul.f32 %v1173_v17, %v524_v18  ;;  %v1177_v23 = vpop.eup %1176  ;;  %v542_v27 = vmul.f32 %v524_v18, %v1497_v32  ;;  %v45_v32 = vld [vmem:[%s1618_s0 + $0x20] sm:$0xff] }
 0x537   :  { %v527_v24 = vmul.f32 %v1177_v23, %v510_v22  ;;  %vm532_vm3 = vweird.f32 %v1177_v23  ;;  %1078 = vmatmul.msk.f32.gmra.mxu0 %vm59_vm0, %v45_v32  ;;  %1086 = vmatmul.msk.f32.gmra.mxu1 %vm59_vm0, %v45_v32 }
 0x538   :  { %545 = vrot.lane.b32.xlu1 %v543_v19, %s1269_s1  ;;  %vm533_vm6 = vmor %vm531_vm4, %vm532_vm3 }
 0x539   :  { %v528_v25 = vsub.f32 1.0, %v527_v24 }
 0x53b   :  { %v529_v26 = vmul.f32 %v1177_v23, %v528_v25 }
 0x53d   :  { %v530_v30 = vadd.f32 %v1177_v23, %v529_v26 }
 0x53f   :  { %v534_v46 = vsel %vm533_vm6, %v1177_v23, %v530_v30  ;;  %1079 = vmatmul.msk.f32.gmra.mxu0 %vm59_vm0, %v46_v2  ;;  %1087 = vmatmul.msk.f32.gmra.mxu1 %vm59_vm0, %v46_v2 }
 0x540   :  { %v539_v52 = vsel %vm536_vm7, %v538_v50, %v534_v46 }
 0x547   :  { %1080 = vmatmul.msk.f32.gmra.mxu0 %vm59_vm0, %v47_v3  ;;  %1088 = vmatmul.msk.f32.gmra.mxu1 %vm59_vm0, %v47_v3 }
 0x54f   :  { %1081 = vmatmul.msk.f32.gmra.mxu0 %vm59_vm0, %v48_v8  ;;  %1089 = vmatmul.msk.f32.gmra.mxu1 %vm59_vm0, %v48_v8 }
 0x5aa   :  { %v546_v28 = vpop.permute.xlu1 %545 }
 0x5ab   :  { %v1528_v29 = vadd.f32 %v546_v28, %v542_v27 }
 0x5ad   :  { %1178 = vtanh.f32 %v1528_v29 }
 0x5b3   :  { %v1179_v51 = vpop.eup %1178 }
 0x5b4   :  { %v550_v53 = vmul.f32 %v1179_v51, %v539_v52 }
 0x5b6   :  { %557 = vrot.lane.b32.xlu2 %v550_v53, %s1269_s1 }
 0x610   :  { %v558_v54 = vpop.permute.xlu2 %557 }
 0x611   :  { %1104 = vmatmul.msk.f32.vlgmr.msrb.gmra.mxu2 %vm259_vm10, %v558_v54  ;;  %1105 = vmatmul.msk.f32.vlgmr.msrb.gmra.mxu3 %vm259_vm10, %v558_v54 }
 0x612   :  { %961 = vmatpush.msrb.mxu2 %v1342_v33  ;;  %981 = vmatpush.msrb.mxu3 %v1344_v34  ;;  %v113_v33 = vpop.f32.mrf.mxu0 }
 0x613   :  { %v114_v34 = vadd.f32 %v113_v33, %v1333_v7 }
 0x614   :  { %962 = vmatpush.msrb.mxu2 %v1346_v35  ;;  %982 = vmatpush.msrb.mxu3 %v1350_v36 }
 0x616   :  { %963 = vmatpush.msrb.mxu2 %v1352_v37  ;;  %983 = vmatpush.msrb.mxu3 %v1354_v38 }
 0x618   :  { %964 = vmatpush.msrb.mxu2 %v1360_v39  ;;  %984 = vmatpush.msrb.mxu3 %v1362_v40  ;;  %v154_v40 = vpop.f32.mrf.mxu1 }
 0x61a   :  { %965 = vmatpush.msrb.mxu2 %v1368_v41  ;;  %985 = vmatpush.msrb.mxu3 %v1370_v42  ;;  %v155_v41 = vadd.f32 %v154_v40, %v1336_v13  ;;  %v116_v23 = vpop.f32.mrf.mxu0 }
 0x61b   :  { %v117_v28 = vadd.f32 %v116_v23, %v1333_v7 }
 0x61c   :  { %966 = vmatpush.msrb.mxu2 %v1376_v44  ;;  %986 = vmatpush.msrb.mxu3 %v1378_v45 }
 0x61e   :  { %967 = vmatpush.msrb.mxu2 %v1384_v47  ;;  %987 = vmatpush.msrb.mxu3 %v1386_v48 }
 0x620   :  { %968 = vmatpush.msrb.mxu2 %v1399_v59  ;;  %988 = vmatpush.msrb.mxu3 %v1401_v60  ;;  %v157_v25 = vpop.f32.mrf.mxu1 }
 0x621   :  { %v158_v51 = vadd.f32 %v157_v25, %v1336_v13 }
 0x622   :  { %v1577_v24 = vpop.f32.mrf.mxu0 }
 0x628   :  { %v1581_v27 = vpop.f32.mrf.mxu1 }
 0x62a   :  { %v1579_v26 = vpop.f32.mrf.mxu0 }
 0x630   :  { %v1584_v43 = vpop.f32.mrf.mxu1 }
 0x694   :  { %v578_v35 = vpop.f32.mrf.mxu2  ;;  %v598_v42 = vpop.f32.mrf.mxu3 }
 0x695   :  { %v579_v36 = vadd.f32 %v578_v35, %v114_v34  ;;  %v599_v45 = vadd.f32 %v598_v42, %v155_v41 }
 0x697   :  { %v1106_v37 = vmul.f32 -1.442695, %v579_v36  ;;  %v1107_v63 = vmul.f32 -1.442695, %v599_v45 }
 0x699   :  { %1180 = vpow2.f32 %v1106_v37 }
 0x69f   :  { %v1181_v38 = vpop.eup %1180 }
 0x6a0   :  { %v607_v39 = vadd.f32 1.0, %v1181_v38 }
 0x6a2   :  { %1182 = vrcp.f32 %v607_v39  ;;  %v620_v59 = vand.u32 2147483648, %v607_v39  ;;  %v618_v55 = vand.u32 2147483647, %v607_v39  ;;  %vm614_vm9 = vweird.f32 %v607_v39 }
 0x6a3   :  { %1184 = vtanh.f32 %v599_v45 }
 0x6a4   :  { %v621_v56 = vor.u32 1.1754944e-38, %v620_v59  ;;  %vm619_vm12 = vcmp.eq.f32.partialorder %v618_v55, 8.507059e+37  ;;  %1186 = vpow2.f32 %v1107_v63 }
 0x6a8   :  { %v1183_v44 = vpop.eup %1182 }
 0x6a9   :  { %v610_v47 = vmul.f32 %v1183_v44, %v607_v39  ;;  %vm615_vm8 = vweird.f32 %v1183_v44  ;;  %v1185_v58 = vpop.eup %1184 }
 0x6aa   :  { %vm616_vm11 = vmor %vm614_vm9, %vm615_vm8  ;;  %v1187_v0 = vpop.eup %1186 }
 0x6ab   :  { %v611_v48 = vsub.f32 1.0, %v610_v47  ;;  %v608_v1 = vadd.f32 1.0, %v1187_v0 }
 0x6ad   :  { %v612_v60 = vmul.f32 %v1183_v44, %v611_v48  ;;  %1188 = vrcp.f32 %v608_v1  ;;  %v635_v15 = vand.u32 2147483648, %v608_v1  ;;  %vm629_vm14 = vweird.f32 %v608_v1 }
 0x6ae   :  { %v633_v16 = vand.u32 2147483647, %v608_v1 }
 0x6af   :  { %v613_v49 = vadd.f32 %v1183_v44, %v612_v60  ;;  %v636_v18 = vor.u32 1.1754944e-38, %v635_v15 }
 0x6b0   :  { %vm634_vm1 = vcmp.eq.f32.partialorder %v633_v16, 8.507059e+37 }
 0x6b1   :  { %v617_v57 = vsel %vm616_vm11, %v1183_v44, %v613_v49 }
 0x6b2   :  { %v622_v61 = vsel %vm619_vm12, %v621_v56, %v617_v57 }
 0x6b3   :  { %v641_v62 = vmul.f32 %v1185_v58, %v622_v61  ;;  %v1189_v4 = vpop.eup %1188  ;;  %v640_v10 = vmul.f32 %v622_v61, %v1528_v29 }
 0x6b4   :  { %v625_v5 = vmul.f32 %v1189_v4, %v608_v1  ;;  %vm630_vm13 = vweird.f32 %v1189_v4 }
 0x6b5   :  { %643 = vrot.lane.b32.xlu0 %v641_v62, %s1269_s1  ;;  %vm631_vm15 = vmor %vm629_vm14, %vm630_vm13 }
 0x6b6   :  { %v626_v6 = vsub.f32 1.0, %v625_v5  ;;  %v120_v5 = vadd.f32 %v1577_v24, %v1333_v7 }
 0x6b8   :  { %v627_v9 = vmul.f32 %v1189_v4, %v626_v6 }
 0x6ba   :  { %v628_v14 = vadd.f32 %v1189_v4, %v627_v9 }
 0x6bc   :  { %v632_v17 = vsel %vm631_vm15, %v1189_v4, %v628_v14  ;;  %v161_v14 = vadd.f32 %v1581_v27, %v1336_v13 }
 0x6bd   :  { %v637_v20 = vsel %vm634_vm1, %v636_v18, %v632_v17 }
 0x727   :  { %v644_v11 = vpop.permute.xlu0 %643 }
 0x728   :  { %v646_v12 = vadd.f32 %v644_v11, %v640_v10 }
 0x72a   :  { %1190 = vtanh.f32 %v646_v12 }
 0x730   :  { %v1191_v19 = vpop.eup %1190 }
 0x731   :  { %v648_v21 = vmul.f32 %v1191_v19, %v637_v20 }
 0x733   :  { %655 = vrot.lane.b32.xlu1 %v648_v21, %s1269_s1 }
 0x7a5   :  { %v656_v22 = vpop.permute.xlu1 %655 }
 0x7a6   :  { %1108 = vmatmul.msk.f32.vlgmr.msrb.gmra.mxu0 %vm259_vm10, %v656_v22  ;;  %1109 = vmatmul.msk.f32.vlgmr.msrb.gmra.mxu1 %vm259_vm10, %v656_v22 }
 0x823   :  { %v676_v29 = vpop.f32.mrf.mxu0  ;;  %v696_v52 = vpop.f32.mrf.mxu1 }
 0x824   :  { %v677_v30 = vadd.f32 %v676_v29, %v117_v28  ;;  %v697_v32 = vadd.f32 %v696_v52, %v158_v51 }
 0x826   :  { %v1110_v31 = vmul.f32 -1.442695, %v677_v30  ;;  %v1111_v44 = vmul.f32 -1.442695, %v697_v32 }
 0x828   :  { %1192 = vpow2.f32 %v1110_v31 }
 0x82e   :  { %v1193_v46 = vpop.eup %1192 }
 0x82f   :  { %v705_v50 = vadd.f32 1.0, %v1193_v46 }
 0x831   :  { %1194 = vrcp.f32 %v705_v50  ;;  %v718_v34 = vand.u32 2147483648, %v705_v50  ;;  %v716_v36 = vand.u32 2147483647, %v705_v50  ;;  %vm712_vm2 = vweird.f32 %v705_v50 }
 0x832   :  { %1196 = vtanh.f32 %v697_v32 }
 0x833   :  { %v719_v38 = vor.u32 1.1754944e-38, %v718_v34  ;;  %vm717_vm4 = vcmp.eq.f32.partialorder %v716_v36, 8.507059e+37  ;;  %1198 = vpow2.f32 %v1111_v44 }
 0x837   :  { %v1195_v53 = vpop.eup %1194 }
 0x838   :  { %v708_v54 = vmul.f32 %v1195_v53, %v705_v50  ;;  %vm713_vm0 = vweird.f32 %v1195_v53  ;;  %v1197_v40 = vpop.eup %1196 }
 0x839   :  { %vm714_vm3 = vmor %vm712_vm2, %vm713_vm0  ;;  %v1199_v45 = vpop.eup %1198 }
 0x83a   :  { %v709_v33 = vsub.f32 1.0, %v708_v54  ;;  %v706_v47 = vadd.f32 1.0, %v1199_v45 }
 0x83c   :  { %v710_v35 = vmul.f32 %v1195_v53, %v709_v33  ;;  %1200 = vrcp.f32 %v706_v47  ;;  %v733_v61 = vand.u32 2147483648, %v706_v47  ;;  %vm727_vm7 = vweird.f32 %v706_v47 }
 0x83d   :  { %v731_v62 = vand.u32 2147483647, %v706_v47 }
 0x83e   :  { %v711_v37 = vadd.f32 %v1195_v53, %v710_v35  ;;  %v734_v0 = vor.u32 1.1754944e-38, %v733_v61 }
 0x83f   :  { %vm732_vm9 = vcmp.eq.f32.partialorder %v731_v62, 8.507059e+37 }
 0x840   :  { %v715_v39 = vsel %vm714_vm3, %v1195_v53, %v711_v37 }
 0x841   :  { %v720_v41 = vsel %vm717_vm4, %v719_v38, %v715_v39 }
 0x842   :  { %v739_v42 = vmul.f32 %v1197_v40, %v720_v41  ;;  %v1201_v48 = vpop.eup %1200  ;;  %v738_v49 = vmul.f32 %v720_v41, %v646_v12 }
 0x843   :  { %v723_v59 = vmul.f32 %v1201_v48, %v706_v47  ;;  %vm728_vm6 = vweird.f32 %v1201_v48 }
 0x844   :  { %741 = vrot.lane.b32.xlu2 %v739_v42, %s1269_s1  ;;  %vm729_vm8 = vmor %vm727_vm7, %vm728_vm6  ;;  %v123_v42 = vadd.f32 %v1579_v26, %v1333_v7 }
 0x845   :  { %v724_v60 = vsub.f32 1.0, %v723_v59 }
 0x847   :  { %v725_v55 = vmul.f32 %v1201_v48, %v724_v60 }
 0x849   :  { %v726_v58 = vadd.f32 %v1201_v48, %v725_v55  ;;  %v164_v55 = vadd.f32 %v1584_v43, %v1336_v13 }
 0x84b   :  { %v730_v63 = vsel %vm729_vm8, %v1201_v48, %v726_v58 }
 0x84c   :  { %v735_v2 = vsel %vm732_vm9, %v734_v0, %v730_v63 }
 0x89e   :  { %v742_v56 = vpop.permute.xlu2 %741 }
 0x89f   :  { %v744_v57 = vadd.f32 %v742_v56, %v738_v49 }
 0x8a1   :  { %1202 = vtanh.f32 %v744_v57 }
 0x8a7   :  { %v1203_v1 = vpop.eup %1202 }
 0x8a8   :  { %v746_v3 = vmul.f32 %v1203_v1, %v735_v2 }
 0x8aa   :  { %753 = vrot.lane.b32.xlu0 %v746_v3, %s1269_s1 }
 0x91c   :  { %v754_v4 = vpop.permute.xlu0 %753 }
 0x91d   :  { %1112 = vmatmul.msk.f32.vlgmr.msra.gmra.mxu2 %vm259_vm10, %v754_v4  ;;  %1113 = vmatmul.msk.f32.vlgmr.msra.gmra.mxu3 %vm259_vm10, %v754_v4 }
 0x9a0   :  { %v774_v6 = vpop.f32.mrf.mxu2  ;;  %v794_v12 = vpop.f32.mrf.mxu3 }
 0x9a1   :  { %v775_v8 = vadd.f32 %v774_v6, %v120_v5  ;;  %v795_v16 = vadd.f32 %v794_v12, %v161_v14 }
 0x9a3   :  { %v1114_v9 = vmul.f32 -1.442695, %v775_v8  ;;  %v1115_v27 = vmul.f32 -1.442695, %v795_v16 }
 0x9a5   :  { %1204 = vpow2.f32 %v1114_v9 }
 0x9ab   :  { %v1205_v10 = vpop.eup %1204 }
 0x9ac   :  { %v803_v11 = vadd.f32 1.0, %v1205_v10 }
 0x9ae   :  { %1206 = vrcp.f32 %v803_v11  ;;  %v816_v19 = vand.u32 2147483648, %v803_v11  ;;  %v814_v21 = vand.u32 2147483647, %v803_v11  ;;  %vm810_vm12 = vweird.f32 %v803_v11 }
 0x9af   :  { %1208 = vtanh.f32 %v795_v16 }
 0x9b0   :  { %v817_v23 = vor.u32 1.1754944e-38, %v816_v19  ;;  %vm815_vm14 = vcmp.eq.f32.partialorder %v814_v21, 8.507059e+37  ;;  %1210 = vpow2.f32 %v1115_v27 }
 0x9b4   :  { %v1207_v15 = vpop.eup %1206 }
 0x9b5   :  { %v806_v17 = vmul.f32 %v1207_v15, %v803_v11  ;;  %vm811_vm11 = vweird.f32 %v1207_v15  ;;  %v1209_v25 = vpop.eup %1208 }
 0x9b6   :  { %vm812_vm13 = vmor %vm810_vm12, %vm811_vm11  ;;  %v1211_v30 = vpop.eup %1210 }
 0x9b7   :  { %v807_v18 = vsub.f32 1.0, %v806_v17  ;;  %v804_v31 = vadd.f32 1.0, %v1211_v30 }
 0x9b9   :  { %v808_v20 = vmul.f32 %v1207_v15, %v807_v18  ;;  %1212 = vrcp.f32 %v804_v31  ;;  %v831_v34 = vand.u32 2147483648, %v804_v31  ;;  %vm825_vm1 = vweird.f32 %v804_v31 }
 0x9ba   :  { %v829_v35 = vand.u32 2147483647, %v804_v31 }
 0x9bb   :  { %v809_v22 = vadd.f32 %v1207_v15, %v808_v20  ;;  %v832_v37 = vor.u32 1.1754944e-38, %v831_v34 }
 0x9bc   :  { %vm830_vm2 = vcmp.eq.f32.partialorder %v829_v35, 8.507059e+37 }
 0x9bd   :  { %v813_v24 = vsel %vm812_vm13, %v1207_v15, %v809_v22 }
 0x9be   :  { %v818_v28 = vsel %vm815_vm14, %v817_v23, %v813_v24  ;;  %v1130_v23 = vld [vmem:[%s1622_s4] ss:$0 sm:$0xff] }
 0x9bf   :  { %v837_v29 = vmul.f32 %v1209_v25, %v818_v28  ;;  %v1213_v46 = vpop.eup %1212  ;;  %v836_v53 = vmul.f32 %v818_v28, %v744_v57  ;;  %v198_v24 = vld [vmem:[%s1621_s3] sm:$0x3]  ;;  %s1271_s3 = smov 32  }
 0x9c0   :  { %v821_v50 = vmul.f32 %v1213_v46, %v804_v31  ;;  %vm826_vm15 = vweird.f32 %v1213_v46  ;;  %v944_v25 = vperm.slane %v198_v24, 0 }
 0x9c1   :  { %839 = vrot.lane.b32.xlu1 %v837_v29, %s1269_s1  ;;  %vm827_vm0 = vmor %vm825_vm1, %vm826_vm15 }
 0x9c2   :  { %v822_v51 = vsub.f32 1.0, %v821_v50 }
 0x9c4   :  { %v823_v52 = vmul.f32 %v1213_v46, %v822_v51 }
 0x9c6   :  { %v824_v33 = vadd.f32 %v1213_v46, %v823_v52 }
 0x9c8   :  { %v828_v36 = vsel %vm827_vm0, %v1213_v46, %v824_v33  ;;  %v945_v46 = vperm.slane %v198_v24, 1 }
 0x9c9   :  { %v833_v39 = vsel %vm830_vm2, %v832_v37, %v828_v36 }
 0xa33   :  { %v840_v32 = vpop.permute.xlu1 %839 }
 0xa34   :  { %v842_v54 = vadd.f32 %v840_v32, %v836_v53 }
 0xa36   :  { %1214 = vtanh.f32 %v842_v54 }
 0xa3c   :  { %v1215_v38 = vpop.eup %1214 }
 0xa3d   :  { %v844_v40 = vmul.f32 %v1215_v38, %v833_v39 }
 0xa3f   :  { %851 = vrot.lane.b32.xlu2 %v844_v40, %s1269_s1 }
 0xa99   :  { %v852_v41 = vpop.permute.xlu2 %851 }
 0xa9a   :  { %1116 = vmatmul.msk.f32.vlgmr.msra.gmra.mxu0 %vm259_vm10, %v852_v41  ;;  %1117 = vmatmul.msk.f32.vlgmr.msra.gmra.mxu1 %vm259_vm10, %v852_v41 }
 0xb17   :  { %v872_v44 = vpop.f32.mrf.mxu0  ;;  %v892_v60 = vpop.f32.mrf.mxu1 }
 0xb18   :  { %v873_v45 = vadd.f32 %v872_v44, %v123_v42  ;;  %v893_v56 = vadd.f32 %v892_v60, %v164_v55 }
 0xb1a   :  { %v1118_v47 = vmul.f32 -1.442695, %v873_v45  ;;  %v1119_v13 = vmul.f32 -1.442695, %v893_v56 }
 0xb1c   :  { %1216 = vpow2.f32 %v1118_v47 }
 0xb22   :  { %v1217_v48 = vpop.eup %1216 }
 0xb23   :  { %v901_v59 = vadd.f32 1.0, %v1217_v48 }
 0xb25   :  { %1218 = vrcp.f32 %v901_v59  ;;  %v914_v61 = vand.u32 2147483648, %v901_v59  ;;  %v912_v7 = vand.u32 2147483647, %v901_v59  ;;  %vm908_vm4 = vweird.f32 %v901_v59 }
 0xb26   :  { %1220 = vtanh.f32 %v893_v56 }
 0xb27   :  { %v915_v63 = vor.u32 1.1754944e-38, %v914_v61  ;;  %vm913_vm7 = vcmp.eq.f32.partialorder %v912_v7, 8.507059e+37  ;;  %1222 = vpow2.f32 %v1119_v13  ;;  %v1131_v13 = vld [vmem:[#allocation3] ss:$0 sm:$0xff] }
 0xb2b   :  { %v1219_v49 = vpop.eup %1218 }
 0xb2c   :  { %v904_v57 = vmul.f32 %v1219_v49, %v901_v59  ;;  %vm909_vm3 = vweird.f32 %v1219_v49  ;;  %v1221_v1 = vpop.eup %1220 }
 0xb2d   :  { %vm910_vm6 = vmor %vm908_vm4, %vm909_vm3  ;;  %v1223_v43 = vpop.eup %1222  ;;  %vm1060_vm4 = vcmask 7168  }
 0xb2e   :  { %v905_v58 = vsub.f32 1.0, %v904_v57  ;;  %v902_v4 = vadd.f32 1.0, %v1223_v43 }
 0xb30   :  { %v906_v62 = vmul.f32 %v1219_v49, %v905_v58  ;;  %1224 = vrcp.f32 %v902_v4  ;;  %v929_v15 = vand.u32 2147483648, %v902_v4  ;;  %vm923_vm9 = vweird.f32 %v902_v4 }
 0xb31   :  { %v927_v16 = vand.u32 2147483647, %v902_v4 }
 0xb32   :  { %v907_v26 = vadd.f32 %v1219_v49, %v906_v62  ;;  %v930_v18 = vor.u32 1.1754944e-38, %v929_v15 }
 0xb33   :  { %vm928_vm12 = vcmp.eq.f32.partialorder %v927_v16, 8.507059e+37 }
 0xb34   :  { %v911_v0 = vsel %vm910_vm6, %v1219_v49, %v907_v26 }
 0xb35   :  { %v916_v2 = vsel %vm913_vm7, %v915_v63, %v911_v0 }
 0xb36   :  { %v935_v3 = vmul.f32 %v1221_v1, %v916_v2  ;;  %v1225_v5 = vpop.eup %1224  ;;  %v934_v10 = vmul.f32 %v916_v2, %v842_v54 }
 0xb37   :  { %v919_v6 = vmul.f32 %v1225_v5, %v902_v4  ;;  %vm924_vm8 = vweird.f32 %v1225_v5 }
 0xb38   :  { %937 = vrot.lane.b32.xlu0 %v935_v3, %s1269_s1  ;;  %vm925_vm11 = vmor %vm923_vm9, %vm924_vm8 }
 0xb39   :  { %v920_v8 = vsub.f32 1.0, %v919_v6 }
 0xb3b   :  { %v921_v9 = vmul.f32 %v1225_v5, %v920_v8 }
 0xb3d   :  { %v922_v14 = vadd.f32 %v1225_v5, %v921_v9 }
 0xb3f   :  { %v926_v17 = vsel %vm925_vm11, %v1225_v5, %v922_v14 }
 0xb40   :  { %v931_v20 = vsel %vm928_vm12, %v930_v18, %v926_v17  ;;  %1044 = vrot.lane.b32.xlu0 %v1130_v23, %s1270_s7 }
 0xbaa   :  { %v938_v11 = vpop.permute.xlu0 %937 }
 0xbab   :  { %v940_v12 = vadd.f32 %v938_v11, %v934_v10 }
 0xbad   :  { %1226 = vtanh.f32 %v940_v12 }
 0xbb2   :  { %v1045_v26 = vpop.permute.xlu0 %1044 }
 0xbb3   :  { %v1227_v19 = vpop.eup %1226 }
 0xbb4   :  { %v942_v21 = vmul.f32 %v1227_v19, %v931_v20 }
 0xbb6   :  { %949 = vrot.lane.b32.xlu1 %v942_v21, %s1269_s1 }
 0xc28   :  { %v950_v22 = vpop.permute.xlu1 %949 }
 0xc29   :  { %1120 = vmatmul.msk.f32.vlgmr.msrb.gmra.mxu2 %vm259_vm10, %v950_v22  ;;  %1121 = vmatmul.msk.f32.vlgmr.msrb.gmra.mxu3 %vm259_vm10, %v950_v22 }
 0xcac   :  { %v970_v28 = vpop.f32.mrf.mxu2  ;;  %v990_v50 = vpop.f32.mrf.mxu3 }
 0xcad   :  { %v971_v29 = vadd.f32 %v970_v28, %v944_v25  ;;  %v991_v52 = vadd.f32 %v990_v50, %v945_v46 }
 0xcaf   :  { %v1122_v27 = vmul.f32 -1.442695, %v971_v29  ;;  %v1123_v41 = vmul.f32 -1.442695, %v991_v52 }
 0xcb1   :  { %1228 = vpow2.f32 %v1122_v27 }
 0xcb7   :  { %v1229_v30 = vpop.eup %1228 }
 0xcb8   :  { %v999_v31 = vadd.f32 1.0, %v1229_v30 }
 0xcba   :  { %1230 = vrcp.f32 %v999_v31  ;;  %v1012_v54 = vand.u32 2147483648, %v999_v31  ;;  %v1010_v34 = vand.u32 2147483647, %v999_v31  ;;  %vm1006_vm13 = vweird.f32 %v999_v31 }
 0xcbb   :  { %1232 = vtanh.f32 %v991_v52 }
 0xcbc   :  { %v1013_v36 = vor.u32 1.1754944e-38, %v1012_v54  ;;  %vm1011_vm15 = vcmp.eq.f32.partialorder %v1010_v34, 8.507059e+37  ;;  %1234 = vpow2.f32 %v1123_v41 }
 0xcc0   :  { %v1231_v51 = vpop.eup %1230 }
 0xcc1   :  { %v1002_v53 = vmul.f32 %v1231_v51, %v999_v31  ;;  %vm1007_vm10 = vweird.f32 %v1231_v51  ;;  %v1233_v38 = vpop.eup %1232 }
 0xcc2   :  { %vm1008_vm14 = vmor %vm1006_vm13, %vm1007_vm10  ;;  %v1235_v42 = vpop.eup %1234 }
 0xcc3   :  { %v1003_v32 = vsub.f32 1.0, %v1002_v53  ;;  %v1000_v44 = vadd.f32 1.0, %v1235_v42 }
 0xcc5   :  { %v1004_v33 = vmul.f32 %v1231_v51, %v1003_v32  ;;  %1236 = vrcp.f32 %v1000_v44  ;;  %v1027_v57 = vand.u32 2147483648, %v1000_v44  ;;  %vm1021_vm0 = vweird.f32 %v1000_v44 }
 0xcc6   :  { %v1025_v58 = vand.u32 2147483647, %v1000_v44 }
 0xcc7   :  { %v1005_v35 = vadd.f32 %v1231_v51, %v1004_v33  ;;  %v1028_v62 = vor.u32 1.1754944e-38, %v1027_v57 }
 0xcc8   :  { %vm1026_vm3 = vcmp.eq.f32.partialorder %v1025_v58, 8.507059e+37 }
 0xcc9   :  { %v1009_v37 = vsel %vm1008_vm14, %v1231_v51, %v1005_v35 }
 0xcca   :  { %v1014_v39 = vsel %vm1011_vm15, %v1013_v36, %v1009_v37 }
 0xccb   :  { %v1033_v40 = vmul.f32 %v1233_v38, %v1014_v39  ;;  %v1237_v45 = vpop.eup %1236  ;;  %v1032_v60 = vmul.f32 %v1014_v39, %v940_v12 }
 0xccc   :  { %v1017_v47 = vmul.f32 %v1237_v45, %v1000_v44  ;;  %vm1022_vm1 = vweird.f32 %v1237_v45 }
 0xccd   :  { %1035 = vrot.lane.b32.xlu2 %v1033_v40, %s1269_s1  ;;  %vm1023_vm2 = vmor %vm1021_vm0, %vm1022_vm1 }
 0xcce   :  { %v1018_v48 = vsub.f32 1.0, %v1017_v47 }
 0xcd0   :  { %v1019_v59 = vmul.f32 %v1237_v45, %v1018_v48 }
 0xcd2   :  { %v1020_v56 = vadd.f32 %v1237_v45, %v1019_v59 }
 0xcd4   :  { %v1024_v61 = vsel %vm1023_vm2, %v1237_v45, %v1020_v56 }
 0xcd5   :  { %v1029_v63 = vsel %vm1026_vm3, %v1028_v62, %v1024_v61 }
 0xd27   :  { %v1036_v55 = vpop.permute.xlu2 %1035 }
 0xd28   :  { %v1038_v49 = vadd.f32 %v1036_v55, %v1032_v60 }
 0xd2a   :  { %1238 = vtanh.f32 %v1038_v49 }
 0xd30   :  { %v1239_v7 = vpop.eup %1238 }
 0xd31   :  { %v1040_v0 = vmul.f32 %v1239_v7, %v1029_v63 }
 0xd33   :  { %v1047_v1 = vmul.f32 %v1045_v26, %v1040_v0 }
 0xd35   :  { %1049 = vrot.lane.b32.xlu1 %v1047_v1, %s1271_s3 }
 0xda7   :  { %v1050_v2 = vpop.permute.xlu1 %1049 }
 0xda8   :  { %v1052_v3 = vsel %vm251_vm5, %v1050_v2, 0.0 }
 0xda9   :  { %1053 = vadd.xlane.f32.xlu2 %v1052_v3 }
 0xe1c   :  { %v1054_v43 = vpop.xlane.xlu2 %1053 }
 0xe1d   :  { %v1059_v4 = vadd.f32 %v1131_v13, %v1054_v43 }
 0xe1f   :  { %1061 = vst.msk [vmem:[%s1624_s6] sm:$0xff] %vm1060_vm4, %v1059_v4 }
 0xe20   :  { %1066 = vsyncpa [#allocation5], 1 }

</bundles_post_ra>
